<compile_context>
chip_gen: v5e
topology: v5e:2x2
jax: 0.10.0
libtpu: 0.0.40
codegen_flags: <defaults>
</compile_context>

<pallas_src>
import functools

import jax
import jax.numpy as jnp
from jax.experimental import pallas as pl
from jax.experimental.pallas import tpu as pltpu


# ---------------------------------------------------------------------------
# Pallas flash-attention forward kernel
# ---------------------------------------------------------------------------
def _attn_fwd_kernel(q_ref, k_ref, v_ref, o_ref, m_sc, l_sc, acc_sc,
                     *, nk, tk, masked):
    """One (head-group, q-tile, kv-tile) grid step of online-softmax attention.

    q_ref: (G, TQ, D), k_ref/v_ref: (G, TK, D), o_ref: (G, TQ, D)
    m_sc/l_sc: (G, TQ, 1) f32 scratch, acc_sc: (G, TQ, D) f32 scratch.
    The softmax scale is already folded into q by the wrapper.
    """
    kv = pl.program_id(2)

    @pl.when(kv == 0)
    def _():
        m_sc[...] = jnp.full(m_sc.shape, -jnp.inf, dtype=m_sc.dtype)
        l_sc[...] = jnp.zeros(l_sc.shape, dtype=l_sc.dtype)
        acc_sc[...] = jnp.zeros(acc_sc.shape, dtype=acc_sc.dtype)

    q = q_ref[...]                      # (G, TQ, D), native dtype
    k = k_ref[...]                      # (G, TK, D), native dtype
    v = v_ref[...]                      # (G, TK, D), native dtype

    # scores: (G, TQ, TK) on the MXU with f32 accumulation (no input upcast).
    s = jax.lax.dot_general(
        q, k, (((2,), (2,)), ((0,), (0,))), preferred_element_type=jnp.float32)

    if masked:  # static: only emitted when the kv length was padded
        col = jax.lax.broadcasted_iota(jnp.int32, (1, 1, tk), 2)
        valid = (col + kv * tk) < nk
        s = jnp.where(valid, s, -jnp.inf)

    m_prev = m_sc[...]                                       # (G, TQ, 1)
    m_new = jnp.maximum(m_prev, jnp.max(s, axis=-1, keepdims=True))
    alpha = jnp.exp(m_prev - m_new)                          # rescale prev partials
    p = jnp.exp(s - m_new)                                   # (G, TQ, TK) f32

    l_sc[...] = alpha * l_sc[...] + jnp.sum(p, axis=-1, keepdims=True)
    acc_sc[...] = alpha * acc_sc[...] + jax.lax.dot_general(
        p.astype(v.dtype), v, (((2,), (1,)), ((0,), (0,))),
        preferred_element_type=jnp.float32)
    m_sc[...] = m_new

    @pl.when(kv == pl.num_programs(2) - 1)
    def _():
        # l > 0 is guaranteed: every query row (incl. padded, zero rows) sees at
        # least one unmasked kv column, so no 1/0 guard is required here.
        inv_l = pl.reciprocal(l_sc[...], approx=True)        # EUP slot
        o_ref[...] = (acc_sc[...] * inv_l).astype(o_ref.dtype)


# ---------------------------------------------------------------------------
# Tiling / padding helpers
# ---------------------------------------------------------------------------
def _round_up(x, m):
    return ((x + m - 1) // m) * m


def _choose_q_tile(nq):
    """q tile <= 256; pad nq up so it divides evenly."""
    if nq >= 256:
        return 256, _round_up(nq, 256)
    return 128, _round_up(nq, 128)


def _choose_kv_tile(nk):
    """Pad nk to a 128-multiple (minimal masked waste) and pick the largest
    tile <= 512 that divides it."""
    nk_pad = _round_up(nk, 128)
    for cand in (512, 256, 128):
        if nk_pad % cand == 0:
            return cand, nk_pad
    return 128, nk_pad


def _vmem_limit_bytes():
    """Generation-aware VMEM limit: leave headroom on v7x (64 MiB physical)."""
    try:
        info = pltpu.get_tpu_info()
        cap = int(getattr(info, "vmem_capacity_bytes"))
        return max(32 * 1024 * 1024, min(int(cap * 0.8), 96 * 1024 * 1024))
    except Exception:
        return 64 * 1024 * 1024


def _kv_block_spec(g, tk, d, n_kv_steps):
    shape = (g, tk, d)
    idx = lambda b, qi, ki: (b, ki, 0)
    # Deeper buffering hides DMA latency behind short per-step compute (v5e).
    if tk <= 256 and n_kv_steps >= 3:
        try:
            return pl.BlockSpec(shape, idx, pipeline_mode=pl.Buffered(3))
        except TypeError:  # older pallas without pipeline_mode kwarg
            pass
    return pl.BlockSpec(shape, idx)


def pallas_attention(q, k, v):
    """q: (BH, Nq, D), k/v: (BH, Nk, D) -> (BH, Nq, D). softmax(q k^T) v.
    (The 1/sqrt(d) scale is expected to be pre-folded into q.)"""
    BH, Nq, D = q.shape
    _, Nk, _ = k.shape

    tq, nq_pad = _choose_q_tile(Nq)
    tk, nk_pad = _choose_kv_tile(Nk)

    # Keep >= 4 parallel output blocks so both TensorCores stay busy on v7x.
    while BH * (nq_pad // tq) < 4 and tq > 128:
        tq //= 2
    # Group two heads per grid step (amortizes 64-wide lane dim) only if it
    # still leaves enough parallel blocks.
    g = 2 if (BH % 2 == 0 and (BH // 2) * (nq_pad // tq) >= 4) else 1

    if nq_pad != Nq:
        q = jnp.pad(q, ((0, 0), (0, nq_pad - Nq), (0, 0)))
    masked = nk_pad != Nk
    if masked:
        k = jnp.pad(k, ((0, 0), (0, nk_pad - Nk), (0, 0)))
        v = jnp.pad(v, ((0, 0), (0, nk_pad - Nk), (0, 0)))

    n_kv_steps = nk_pad // tk
    grid = (BH // g, nq_pad // tq, n_kv_steps)

    kernel = functools.partial(_attn_fwd_kernel, nk=Nk, tk=tk, masked=masked)

    out = pl.pallas_call(
        kernel,
        out_shape=jax.ShapeDtypeStruct((BH, nq_pad, D), q.dtype),
        grid_spec=pltpu.PrefetchScalarGridSpec(
            num_scalar_prefetch=0,
            grid=grid,
            in_specs=[
                pl.BlockSpec((g, tq, D), lambda b, qi, ki: (b, qi, 0)),
                _kv_block_spec(g, tk, D, n_kv_steps),
                _kv_block_spec(g, tk, D, n_kv_steps),
            ],
            out_specs=pl.BlockSpec((g, tq, D), lambda b, qi, ki: (b, qi, 0)),
            scratch_shapes=[
                pltpu.VMEM((g, tq, 1), jnp.float32),   # running max m_i
                pltpu.VMEM((g, tq, 1), jnp.float32),   # running denom l_i
                pltpu.VMEM((g, tq, D), jnp.float32),   # output accumulator
            ],
        ),
        compiler_params=pltpu.CompilerParams(
            dimension_semantics=("parallel", "parallel", "arbitrary"),
            vmem_limit_bytes=_vmem_limit_bytes(),
        ),
    )(q, k, v)
    return out[:, :Nq, :]


# ---------------------------------------------------------------------------
# JAX wrapper: NHWC DepthWiseConv2d projections + head reshapes + output proj
# ---------------------------------------------------------------------------
def _depthwise_conv_block_nhwc(x, dw_w, bn_gamma, bn_beta, bn_mean, bn_var,
                               pw_w, *, stride, padding, eps=1e-5):
    """Conv2d(groups=C) -> BatchNorm2d(eval) -> Conv2d(1x1), bias-free, NHWC."""
    dim_in = x.shape[-1]
    y = jax.lax.conv_general_dilated(
        x, dw_w, window_strides=(stride, stride),
        padding=[(padding, padding), (padding, padding)],
        dimension_numbers=("NHWC", "HWIO", "NHWC"),
        feature_group_count=dim_in)
    inv = jax.lax.rsqrt(bn_var + eps)
    y = (y - bn_mean) * (bn_gamma * inv) + bn_beta
    y = jax.lax.conv_general_dilated(
        y, pw_w, window_strides=(1, 1), padding="VALID",
        dimension_numbers=("NHWC", "HWIO", "NHWC"))
    return y


def attention_forward(x, params, *, heads, dim_head, proj_kernel,
                      kv_proj_stride, use_pallas=True):
    b, dim, H, W = x.shape
    inner = heads * dim_head
    scale = dim_head ** -0.5
    pad = proj_kernel // 2

    # NCHW -> NHWC once (TPU-native conv layout).
    xh = jnp.transpose(x, (0, 2, 3, 1))

    # PyTorch OIHW weights -> HWIO (tiny weight-only transposes).
    q_dw = jnp.transpose(params["q_dw_w"], (2, 3, 1, 0))
    q_pw = jnp.transpose(params["q_pw_w"], (2, 3, 1, 0)) * scale  # fold softmax scale
    kv_dw = jnp.transpose(params["kv_dw_w"], (2, 3, 1, 0))
    kv_pw = jnp.transpose(params["kv_pw_w"], (2, 3, 1, 0))
    out_w = jnp.transpose(params["out_w"], (2, 3, 1, 0))

    q = _depthwise_conv_block_nhwc(
        xh, q_dw, params["q_bn_gamma"], params["q_bn_beta"],
        params["q_bn_mean"], params["q_bn_var"], q_pw,
        stride=1, padding=pad)
    kv = _depthwise_conv_block_nhwc(
        xh, kv_dw, params["kv_bn_gamma"], params["kv_bn_beta"],
        params["kv_bn_mean"], params["kv_bn_var"], kv_pw,
        stride=kv_proj_stride, padding=pad)
    k, v = jnp.split(kv, 2, axis=-1)

    Hq, Wq = q.shape[1], q.shape[2]
    Hk, Wk = k.shape[1], k.shape[2]
    Nq, Nk = Hq * Wq, Hk * Wk

    # 'b x y (h d) -> (b h) (x y) d'
    def to_heads(t, n):
        t = t.reshape(b, n, heads, dim_head)
        return jnp.transpose(t, (0, 2, 1, 3)).reshape(b * heads, n, dim_head)

    qh = to_heads(q, Nq)
    kh = to_heads(k, Nk)
    vh = to_heads(v, Nk)

    if use_pallas:
        oh = pallas_attention(qh, kh, vh)
    else:  # pure-JAX reference attention core (scale already folded into q)
        dots = jnp.einsum("bid,bjd->bij", qh, kh)
        attn = jax.nn.softmax(dots, axis=-1)
        oh = jnp.einsum("bij,bjd->bid", attn, vh)

    # '(b h) (x y) d -> b x y (h d)'
    out = oh.reshape(b, heads, Nq, dim_head)
    out = jnp.transpose(out, (0, 2, 1, 3)).reshape(b, Hq, Wq, inner)

    # to_out: 1x1 conv (with bias) + Dropout(p=0.0) == identity.
    out = jax.lax.conv_general_dilated(
        out, out_w, window_strides=(1, 1), padding="VALID",
        dimension_numbers=("NHWC", "HWIO", "NHWC"))
    out = out + params["out_b"]
    return jnp.transpose(out, (0, 3, 1, 2))   # back to NCHW


# ---------------------------------------------------------------------------
# Deterministic parameter init (shapes match the PyTorch module, OIHW)
# ---------------------------------------------------------------------------
def init_params(key, dim, heads, dim_head, proj_kernel):
    inner = heads * dim_head
    keys = jax.random.split(key, 10)
    kk = proj_kernel

    def norm(k, shape, fan_in):
        return jax.random.normal(k, shape, jnp.float32) / jnp.sqrt(float(fan_in))

    return {
        # to_q: depthwise conv (dim, 1, k, k), BN(dim), pointwise (inner, dim, 1, 1)
        "q_dw_w": norm(keys[0], (dim, 1, kk, kk), kk * kk),
        "q_bn_gamma": jnp.ones((dim,), jnp.float32),
        "q_bn_beta": jnp.zeros((dim,), jnp.float32),
        "q_bn_mean": 0.1 * jax.random.normal(keys[1], (dim,), jnp.float32),
        "q_bn_var": 1.0 + 0.1 * jax.random.normal(keys[2], (dim,), jnp.float32) ** 2,
        "q_pw_w": norm(keys[3], (inner, dim, 1, 1), dim),
        # to_kv: depthwise conv (dim, 1, k, k), BN(dim), pointwise (2*inner, dim, 1, 1)
        "kv_dw_w": norm(keys[4], (dim, 1, kk, kk), kk * kk),
        "kv_bn_gamma": jnp.ones((dim,), jnp.float32),
        "kv_bn_beta": jnp.zeros((dim,), jnp.float32),
        "kv_bn_mean": 0.1 * jax.random.normal(keys[5], (dim,), jnp.float32),
        "kv_bn_var": 1.0 + 0.1 * jax.random.normal(keys[6], (dim,), jnp.float32) ** 2,
        "kv_pw_w": norm(keys[7], (2 * inner, dim, 1, 1), dim),
        # to_out: 1x1 conv (dim, inner, 1, 1) with bias
        "out_w": norm(keys[8], (dim, inner, 1, 1), inner),
        "out_b": 0.02 * jax.random.normal(keys[9], (dim,), jnp.float32),
    }


if __name__ == "__main__":
    key = jax.random.PRNGKey(0)
    batch, dim, H, W = 2, 32, 16, 16
    heads, dim_head = 2, 64
    proj_kernel, kv_proj_stride = 3, 2

    k_x, k_p = jax.random.split(key)
    x = jax.random.normal(k_x, (batch, dim, H, W), dtype=jnp.float32)
    params = init_params(k_p, dim, heads, dim_head, proj_kernel)

    out = attention_forward(
        x, params, heads=heads, dim_head=dim_head,
        proj_kernel=proj_kernel, kv_proj_stride=kv_proj_stride, use_pallas=True)
    out = jax.block_until_ready(out)

    ref = attention_forward(
        x, params, heads=heads, dim_head=dim_head,
        proj_kernel=proj_kernel, kv_proj_stride=kv_proj_stride, use_pallas=False)
    ref = jax.block_until_ready(ref)

    assert out.shape == (batch, dim, H, W), out.shape
    max_err = float(jnp.max(jnp.abs(out - ref)))
    assert jnp.allclose(out, ref, atol=2e-2, rtol=2e-2), f"max abs err {max_err}"

    print("KERNEL_OK")
</pallas_src>

<mosaic_0001>
module attributes {stable_mosaic.version = 11 : i64} {
  func.func @_attn_fwd_kernel(%arg0: i32, %arg1: i32, %arg2: i32, %arg3: memref<1x256x64xf32, #tpu.memory_space<vmem>>, %arg4: memref<1x128x64xf32, #tpu.memory_space<vmem>>, %arg5: memref<1x128x64xf32, #tpu.memory_space<vmem>>, %arg6: memref<1x256x64xf32, #tpu.memory_space<vmem>>, %arg7: memref<1x256x1xf32, #tpu.memory_space<vmem>>, %arg8: memref<1x256x1xf32, #tpu.memory_space<vmem>>, %arg9: memref<1x256x64xf32, #tpu.memory_space<vmem>>) attributes {dimension_semantics = [#tpu.dimension_semantics<parallel>, #tpu.dimension_semantics<parallel>, #tpu.dimension_semantics<arbitrary>], iteration_bounds = array<i64: 4, 1, 1>, scalar_prefetch = 0 : i64, scratch_operands = 3 : i64, tpu.core_type = #tpu.core_type<tc>, window_params = [{transform_indices = @transform_0, window_bounds = array<i64: 1, 256, 64>}, {transform_indices = @transform_1, window_bounds = array<i64: 1, 128, 64>}, {transform_indices = @transform_2, window_bounds = array<i64: 1, 128, 64>}, {transform_indices = @transform_3, window_bounds = array<i64: 1, 256, 64>}]} {
    %c0_i32 = arith.constant 0 : i32
    %0 = arith.cmpi eq, %arg2, %c0_i32 : i32
    %1 = arith.extui %0 : i1 to i32
    %c0_i32_0 = arith.constant 0 : i32
    %2 = arith.cmpi ne, %1, %c0_i32_0 : i32
    scf.if %2 {
      %cst_33 = arith.constant 0xFF800000 : f32
      %42 = vector.broadcast %cst_33 : f32 to vector<1x256x1xf32>
      %c0_34 = arith.constant 0 : index
      %c0_35 = arith.constant 0 : index
      %c0_36 = arith.constant 0 : index
      %43 = vector.load %arg7[%c0_34, %c0_35, %c0_36] : memref<1x256x1xf32, #tpu.memory_space<vmem>>, vector<1x256x1xf32>
      tpu.vector_store %arg7[%c0_34, %c0_35, %c0_36], %42 {strides = array<i32>} : memref<1x256x1xf32, #tpu.memory_space<vmem>>, vector<1x256x1xf32>,
      %cst_37 = arith.constant 0.000000e+00 : f32
      %44 = vector.broadcast %cst_37 : f32 to vector<1x256x1xf32>
      %c0_38 = arith.constant 0 : index
      %c0_39 = arith.constant 0 : index
      %c0_40 = arith.constant 0 : index
      %45 = vector.load %arg8[%c0_38, %c0_39, %c0_40] : memref<1x256x1xf32, #tpu.memory_space<vmem>>, vector<1x256x1xf32>
      tpu.vector_store %arg8[%c0_38, %c0_39, %c0_40], %44 {strides = array<i32>} : memref<1x256x1xf32, #tpu.memory_space<vmem>>, vector<1x256x1xf32>,
      %cst_41 = arith.constant 0.000000e+00 : f32
      %46 = vector.broadcast %cst_41 : f32 to vector<1x256x64xf32>
      %c0_42 = arith.constant 0 : index
      %c0_43 = arith.constant 0 : index
      %c0_44 = arith.constant 0 : index
      %47 = vector.load %arg9[%c0_42, %c0_43, %c0_44] : memref<1x256x64xf32, #tpu.memory_space<vmem>>, vector<1x256x64xf32>
      tpu.vector_store %arg9[%c0_42, %c0_43, %c0_44], %46 {strides = array<i32>} : memref<1x256x64xf32, #tpu.memory_space<vmem>>, vector<1x256x64xf32>,
    } else {
    }
    %c0 = arith.constant 0 : index
    %c0_1 = arith.constant 0 : index
    %c0_2 = arith.constant 0 : index
    %3 = vector.load %arg3[%c0, %c0_1, %c0_2] : memref<1x256x64xf32, #tpu.memory_space<vmem>>, vector<1x256x64xf32>
    %c0_3 = arith.constant 0 : index
    %c0_4 = arith.constant 0 : index
    %c0_5 = arith.constant 0 : index
    %4 = vector.load %arg4[%c0_3, %c0_4, %c0_5] : memref<1x128x64xf32, #tpu.memory_space<vmem>>, vector<1x128x64xf32>
    %c0_6 = arith.constant 0 : index
    %c0_7 = arith.constant 0 : index
    %c0_8 = arith.constant 0 : index
    %5 = vector.load %arg5[%c0_6, %c0_7, %c0_8] : memref<1x128x64xf32, #tpu.memory_space<vmem>>, vector<1x128x64xf32>
    %cst = arith.constant dense<0.000000e+00> : vector<1x256x128xf32>
    %6 = tpu.matmul %3, %4, %cst {dimension_numbers = #tpu.dot_dimension_numbers<[2], [2], [1], [1], [0, 0, 0, 1, 1, 1], [0], [0]>} : vector<1x256x64xf32>, vector<1x128x64xf32>, vector<1x256x128xf32> -> vector<1x256x128xf32>
    %7 = tpu.iota {dimensions = array<i32: 2>} : vector<1x1x128xi32>
    %c128_i32 = arith.constant 128 : i32
    %8 = arith.muli %arg2, %c128_i32 : i32
    %9 = vector.broadcast %8 : i32 to vector<1x1x128xi32>
    %10 = arith.addi %7, %9 : vector<1x1x128xi32>
    %c64_i32 = arith.constant 64 : i32
    %11 = vector.broadcast %c64_i32 : i32 to vector<1x1x128xi32>
    %12 = arith.cmpi slt, %10, %11 : vector<1x1x128xi32>
    %cst_9 = arith.constant 0xFF800000 : f32
    %13 = vector.shape_cast %12 : vector<1x1x128xi1> to vector<1x1x128xi1>
    %14 = vector.broadcast %13 : vector<1x1x128xi1> to vector<1x256x128xi1>
    %15 = vector.broadcast %cst_9 : f32 to vector<1x256x128xf32>
    %16 = arith.select %14, %6, %15 : vector<1x256x128xi1>, vector<1x256x128xf32>
    %c0_10 = arith.constant 0 : index
    %c0_11 = arith.constant 0 : index
    %c0_12 = arith.constant 0 : index
    %17 = vector.load %arg7[%c0_10, %c0_11, %c0_12] : memref<1x256x1xf32, #tpu.memory_space<vmem>>, vector<1x256x1xf32>
    %cst_13 = arith.constant dense<0xFF800000> : vector<1x256xf32>
    %18 = vector.multi_reduction <maximumf>, %16, %cst_13 [2] : vector<1x256x128xf32> to vector<1x256xf32>
    %19 = vector.shape_cast %18 : vector<1x256xf32> to vector<1x256x1xf32>
    %20 = arith.maximumf %17, %19 : vector<1x256x1xf32>
    %21 = arith.subf %17, %20 : vector<1x256x1xf32>
    %22 = math.exp %21 : vector<1x256x1xf32>
    %23 = vector.broadcast %20 : vector<1x256x1xf32> to vector<1x256x128xf32>
    %24 = arith.subf %16, %23 : vector<1x256x128xf32>
    %25 = math.exp %24 : vector<1x256x128xf32>
    %c0_14 = arith.constant 0 : index
    %c0_15 = arith.constant 0 : index
    %c0_16 = arith.constant 0 : index
    %26 = vector.load %arg8[%c0_14, %c0_15, %c0_16] : memref<1x256x1xf32, #tpu.memory_space<vmem>>, vector<1x256x1xf32>
    %27 = arith.mulf %22, %26 : vector<1x256x1xf32>
    %cst_17 = arith.constant dense<0.000000e+00> : vector<1x256xf32>
    %28 = vector.multi_reduction <add>, %25, %cst_17 [2] : vector<1x256x128xf32> to vector<1x256xf32>
    %29 = vector.shape_cast %28 : vector<1x256xf32> to vector<1x256x1xf32>
    %30 = arith.addf %27, %29 : vector<1x256x1xf32>
    %c0_18 = arith.constant 0 : index
    %c0_19 = arith.constant 0 : index
    %c0_20 = arith.constant 0 : index
    %31 = vector.load %arg8[%c0_18, %c0_19, %c0_20] : memref<1x256x1xf32, #tpu.memory_space<vmem>>, vector<1x256x1xf32>
    tpu.vector_store %arg8[%c0_18, %c0_19, %c0_20], %30 {strides = array<i32>} : memref<1x256x1xf32, #tpu.memory_space<vmem>>, vector<1x256x1xf32>,
    %c0_21 = arith.constant 0 : index
    %c0_22 = arith.constant 0 : index
    %c0_23 = arith.constant 0 : index
    %32 = vector.load %arg9[%c0_21, %c0_22, %c0_23] : memref<1x256x64xf32, #tpu.memory_space<vmem>>, vector<1x256x64xf32>
    %33 = vector.broadcast %22 : vector<1x256x1xf32> to vector<1x256x64xf32>
    %34 = arith.mulf %33, %32 : vector<1x256x64xf32>
    %cst_24 = arith.constant dense<0.000000e+00> : vector<1x256x64xf32>
    %35 = tpu.matmul %25, %5, %cst_24 {dimension_numbers = #tpu.dot_dimension_numbers<[2], [1], [1], [2], [0, 0, 0, 1, 1, 2], [0], [0]>} : vector<1x256x128xf32>, vector<1x128x64xf32>, vector<1x256x64xf32> -> vector<1x256x64xf32>
    %36 = arith.addf %34, %35 : vector<1x256x64xf32>
    %c0_25 = arith.constant 0 : index
    %c0_26 = arith.constant 0 : index
    %c0_27 = arith.constant 0 : index
    %37 = vector.load %arg9[%c0_25, %c0_26, %c0_27] : memref<1x256x64xf32, #tpu.memory_space<vmem>>, vector<1x256x64xf32>
    tpu.vector_store %arg9[%c0_25, %c0_26, %c0_27], %36 {strides = array<i32>} : memref<1x256x64xf32, #tpu.memory_space<vmem>>, vector<1x256x64xf32>,
    %c0_28 = arith.constant 0 : index
    %c0_29 = arith.constant 0 : index
    %c0_30 = arith.constant 0 : index
    %38 = vector.load %arg7[%c0_28, %c0_29, %c0_30] : memref<1x256x1xf32, #tpu.memory_space<vmem>>, vector<1x256x1xf32>
    tpu.vector_store %arg7[%c0_28, %c0_29, %c0_30], %20 {strides = array<i32>} : memref<1x256x1xf32, #tpu.memory_space<vmem>>, vector<1x256x1xf32>,
    %c0_i32_31 = arith.constant 0 : i32
    %39 = arith.cmpi eq, %arg2, %c0_i32_31 : i32
    %40 = arith.extui %39 : i1 to i32
    %c0_i32_32 = arith.constant 0 : i32
    %41 = arith.cmpi ne, %40, %c0_i32_32 : i32
    scf.if %41 {
      %c0_33 = arith.constant 0 : index
      %c0_34 = arith.constant 0 : index
      %c0_35 = arith.constant 0 : index
      %42 = vector.load %arg8[%c0_33, %c0_34, %c0_35] : memref<1x256x1xf32, #tpu.memory_space<vmem>>, vector<1x256x1xf32>
      %43 = tpu.reciprocal %42 {approx = true} : vector<1x256x1xf32> -> vector<1x256x1xf32>
      %c0_36 = arith.constant 0 : index
      %c0_37 = arith.constant 0 : index
      %c0_38 = arith.constant 0 : index
      %44 = vector.load %arg9[%c0_36, %c0_37, %c0_38] : memref<1x256x64xf32, #tpu.memory_space<vmem>>, vector<1x256x64xf32>
      %45 = vector.broadcast %43 : vector<1x256x1xf32> to vector<1x256x64xf32>
      %46 = arith.mulf %44, %45 : vector<1x256x64xf32>
      %c0_39 = arith.constant 0 : index
      %c0_40 = arith.constant 0 : index
      %c0_41 = arith.constant 0 : index
      %47 = vector.load %arg6[%c0_39, %c0_40, %c0_41] : memref<1x256x64xf32, #tpu.memory_space<vmem>>, vector<1x256x64xf32>
      tpu.vector_store %arg6[%c0_39, %c0_40, %c0_41], %46 {strides = array<i32>} : memref<1x256x64xf32, #tpu.memory_space<vmem>>, vector<1x256x64xf32>,
    } else {
    }
    return
  }
  func.func @transform_0(%arg0: i32, %arg1: i32, %arg2: i32) -> (i32, i32, i32) {
    %c0_i32 = arith.constant 0 : i32
    %c0_i32_0 = arith.constant 0 : i32
    return %arg0, %arg1, %c0_i32 : i32, i32, i32
  }
  func.func @transform_1(%arg0: i32, %arg1: i32, %arg2: i32) -> (i32, i32, i32) {
    %c0_i32 = arith.constant 0 : i32
    %c0_i32_0 = arith.constant 0 : i32
    return %arg0, %arg2, %c0_i32 : i32, i32, i32
  }
  func.func @transform_2(%arg0: i32, %arg1: i32, %arg2: i32) -> (i32, i32, i32) {
    %c0_i32 = arith.constant 0 : i32
    %c0_i32_0 = arith.constant 0 : i32
    return %arg0, %arg2, %c0_i32 : i32, i32, i32
  }
  func.func @transform_3(%arg0: i32, %arg1: i32, %arg2: i32) -> (i32, i32, i32) {
    %c0_i32 = arith.constant 0 : i32
    %c0_i32_0 = arith.constant 0 : i32
    return %arg0, %arg1, %c0_i32 : i32, i32, i32
  }
}

</mosaic_0001>

<bundles_post_ra>
// kernel: tpu_custom_call.1
= control target key start
LH: loop header
LB: loop body
LE: loop exit
PB: predicated region body
PF: predicated region fallthrough
CT: control target
= control target key end

     0   :  { %s2708_s12 = smov 0   ;;  %s2710_s13 = smov 0   ;;  %s4062_s0 = inlined_call_operand.vmem [shape: f32[4,256,64], index: 0, kind: input, shape index: {}]   ;;  %s4063_s1 = inlined_call_operand.vmem [shape: f32[4,128,64], index: 1, kind: input, shape index: {}]   ;;  %s4064_s2 = inlined_call_operand.vmem [shape: f32[4,128,64], index: 2, kind: input, shape index: {}]   ;;  %s4065_s3 = inlined_call_operand.vmem [shape: f32[4,256,64], index: 3, kind: output, shape index: {}]  }
   0x1   :  { %s2712_s14 = smov 0  }
   0x2 LB: > { %s32_s15 = sadd.s32 1, %s2679_s13  ;;  %p2312_p0 = scmp.ge.s32.totalorder %s2683_s14, 1  ;;  %s2683_s14 = sphi %s2712_s14, %s13_s14   ;;  %s2679_s13 = sphi %s2710_s13, %s4168_s13   ;;  %s2675_s12 = sphi %s2708_s12, %s4167_s12  }
   0x3   : > { %p34_p1 = scmp.ge.s32.totalorder %s32_s15, 4  ;;  %p199_p2 = scmp.lt.s32.totalorder %s2683_s14, 5 }
   0x5   : > { %s4170_s15 = smov (%p34_p1, %s32_s15), 0  ;;  %p200_p3 = pnand %p2312_p0, %p199_p2 }
   0x7   : > { %203 = sbr.rel (%p200_p3) target bundleno = 879 (0x36f), region = 32 }
   0xc   : > { %p250_p4 = scmp.lt.s32.totalorder %s2675_s12, 3  ;;  %vm358_vm0 = vcmask 523264   ;;  %v713_v48 = vlaneseq  ;;  %vm293_vm2 = vcmask 7168  }
   0xe   : > { %s4172_s12 = smov (!%p250_p4, %s2675_s12), 3  ;;  %v2872_v49 = vand.u32 127, %v713_v48 }
   0xf   : > { %s2372_s16 = sshll.u32 %s4172_s12, 7  ;;  %s2371_s20 = sshll.u32 %s4172_s12, 8 }
  0x10   : > { %s2734_s19 = scalar_lea.vmem %s4063_s1, %s2372_s16  ;;  %s2801_s23 = scalar_lea.vmem %s4062_s0, %s2371_s20  ;;  %vm718_vm1 = vcmp.lt.s32.totalorder %v2872_v49, 64 }
  0x11   : > { %v438_v0 = vld [vmem:[%s2734_s19 + $0x78] sm:$0xff]  ;;  %v437_v1 = vld [vmem:[%s2734_s19 + $0x70] sm:$0xff]  ;;  %v436_v2 = vld [vmem:[%s2734_s19 + $0x68] sm:$0xff]  ;;  %s3339_s26 = scalar_lea.vmem %s4064_s2, %s2372_s16  ;;  %s3972_s29 = scalar_lea.vmem %s4065_s3, %s2371_s20 }
  0x12   : > { %2321 = vmatpush.xpose.msk.msra.mxu0 %vm358_vm0, %v438_v0  ;;  %2375 = vmatpush.xpose.msk.msra.mxu2 %vm358_vm0, %v438_v0  ;;  %v435_v3 = vld [vmem:[%s2734_s19 + $0x60] sm:$0xff]  ;;  %v434_v4 = vld [vmem:[%s2734_s19 + $0x58] sm:$0xff]  ;;  %v433_v5 = vld [vmem:[%s2734_s19 + $0x50] sm:$0xff] }
  0x13   : > { %2376 = vmatpush.xpose.msk.msra.mxu3 %vm358_vm0, %v438_v0  ;;  %v432_v6 = vld [vmem:[%s2734_s19 + $0x48] sm:$0xff]  ;;  %v431_v7 = vld [vmem:[%s2734_s19 + $0x40] sm:$0xff]  ;;  %v430_v8 = vld [vmem:[%s2734_s19 + $0x38] sm:$0xff] }
  0x14   : > { %v429_v9 = vld [vmem:[%s2734_s19 + $0x30] sm:$0xff]  ;;  %v428_v10 = vld [vmem:[%s2734_s19 + $0x28] sm:$0xff]  ;;  %v427_v11 = vld [vmem:[%s2734_s19 + $0x20] sm:$0xff] }
  0x15   : > { %v426_v12 = vld [vmem:[%s2734_s19 + $0x18] sm:$0xff]  ;;  %v425_v13 = vld [vmem:[%s2734_s19 + $0x10] sm:$0xff]  ;;  %v424_v14 = vld [vmem:[%s2734_s19 + $0x8] sm:$0xff] }
  0x16   : > { %2322 = vmatpush.xpose.msk.msra.mxu0 %vm358_vm0, %v437_v1  ;;  %2377 = vmatpush.xpose.msk.msra.mxu2 %vm358_vm0, %v437_v1  ;;  %v423_v15 = vld [vmem:[%s2734_s19] sm:$0xff]  ;;  %v404_v17 = vld [vmem:[%s2801_s23 + $0x68] sm:$0xff]  ;;  %v405_v20 = vld [vmem:[%s2801_s23 + $0x70] sm:$0xff] }
  0x17   : > { %2378 = vmatpush.xpose.msk.msra.mxu3 %vm358_vm0, %v437_v1  ;;  %v391_v16 = vld [vmem:[%s2801_s23] sm:$0xff]  ;;  %v392_v19 = vld [vmem:[%s2801_s23 + $0x8] sm:$0xff]  ;;  %v393_v22 = vld [vmem:[%s2801_s23 + $0x10] sm:$0xff] }
  0x18   : > { %v419_v18 = vld [vmem:[%s2801_s23 + $0xe0] sm:$0xff]  ;;  %v420_v21 = vld [vmem:[%s2801_s23 + $0xe8] sm:$0xff]  ;;  %v406_v23 = vld [vmem:[%s2801_s23 + $0x78] sm:$0xff] }
  0x19   : > { %v421_v24 = vld [vmem:[%s2801_s23 + $0xf0] sm:$0xff]  ;;  %v394_v25 = vld [vmem:[%s2801_s23 + $0x18] sm:$0xff]  ;;  %v407_v26 = vld [vmem:[%s2801_s23 + $0x80] sm:$0xff] }
  0x1a   : > { %2323 = vmatpush.xpose.msk.msra.mxu0 %vm358_vm0, %v436_v2  ;;  %2379 = vmatpush.xpose.msk.msra.mxu2 %vm358_vm0, %v436_v2  ;;  %v422_v27 = vld [vmem:[%s2801_s23 + $0xf8] sm:$0xff]  ;;  %v395_v28 = vld [vmem:[%s2801_s23 + $0x20] sm:$0xff]  ;;  %v408_v29 = vld [vmem:[%s2801_s23 + $0x88] sm:$0xff] }
  0x1b   : > { %2380 = vmatpush.xpose.msk.msra.mxu3 %vm358_vm0, %v436_v2  ;;  %v409_v30 = vld [vmem:[%s2801_s23 + $0x90] sm:$0xff]  ;;  %v396_v31 = vld [vmem:[%s2801_s23 + $0x28] sm:$0xff]  ;;  %v410_v32 = vld [vmem:[%s2801_s23 + $0x98] sm:$0xff] }
  0x1c   : > { %v397_v33 = vld [vmem:[%s2801_s23 + $0x30] sm:$0xff]  ;;  %v411_v34 = vld [vmem:[%s2801_s23 + $0xa0] sm:$0xff]  ;;  %v398_v35 = vld [vmem:[%s2801_s23 + $0x38] sm:$0xff] }
  0x1d   : > { %v412_v36 = vld [vmem:[%s2801_s23 + $0xa8] sm:$0xff]  ;;  %v399_v37 = vld [vmem:[%s2801_s23 + $0x40] sm:$0xff]  ;;  %v413_v38 = vld [vmem:[%s2801_s23 + $0xb0] sm:$0xff] }
  0x1e   : > { %2324 = vmatpush.xpose.msk.msra.mxu0 %vm358_vm0, %v435_v3  ;;  %2381 = vmatpush.xpose.msk.msra.mxu2 %vm358_vm0, %v435_v3  ;;  %v400_v39 = vld [vmem:[%s2801_s23 + $0x48] sm:$0xff]  ;;  %v414_v40 = vld [vmem:[%s2801_s23 + $0xb8] sm:$0xff]  ;;  %v401_v41 = vld [vmem:[%s2801_s23 + $0x50] sm:$0xff] }
  0x1f   : > { %2382 = vmatpush.xpose.msk.msra.mxu3 %vm358_vm0, %v435_v3  ;;  %v415_v42 = vld [vmem:[%s2801_s23 + $0xc0] sm:$0xff]  ;;  %v402_v43 = vld [vmem:[%s2801_s23 + $0x58] sm:$0xff]  ;;  %v416_v44 = vld [vmem:[%s2801_s23 + $0xc8] sm:$0xff] }
  0x20   : > { %v403_v45 = vld [vmem:[%s2801_s23 + $0x60] sm:$0xff]  ;;  %v417_v46 = vld [vmem:[%s2801_s23 + $0xd0] sm:$0xff]  ;;  %v418_v47 = vld [vmem:[%s2801_s23 + $0xd8] sm:$0xff] }
  0x22   : > { %2325 = vmatpush.xpose.msk.msra.mxu0 %vm358_vm0, %v434_v4  ;;  %2383 = vmatpush.xpose.msk.msra.mxu2 %vm358_vm0, %v434_v4 }
  0x23   : > { %2384 = vmatpush.xpose.msk.msra.mxu3 %vm358_vm0, %v434_v4 }
  0x26   : > { %2326 = vmatpush.xpose.msk.msra.mxu0 %vm358_vm0, %v433_v5  ;;  %2385 = vmatpush.xpose.msk.msra.mxu2 %vm358_vm0, %v433_v5 }
  0x27   : > { %2386 = vmatpush.xpose.msk.msra.mxu3 %vm358_vm0, %v433_v5 }
  0x2a   : > { %2327 = vmatpush.xpose.msk.msra.mxu0 %vm358_vm0, %v432_v6  ;;  %2387 = vmatpush.xpose.msk.msra.mxu2 %vm358_vm0, %v432_v6 }
  0x2b   : > { %2388 = vmatpush.xpose.msk.msra.mxu3 %vm358_vm0, %v432_v6 }
  0x2e   : > { %2328 = vmatpush.xpose.msk.msra.mxu0 %vm358_vm0, %v431_v7  ;;  %2389 = vmatpush.xpose.msk.msra.mxu2 %vm358_vm0, %v431_v7 }
  0x2f   : > { %2390 = vmatpush.xpose.msk.msra.mxu3 %vm358_vm0, %v431_v7 }
  0x32   : > { %2329 = vmatpush.xpose.msk.msra.mxu0 %vm358_vm0, %v430_v8  ;;  %2391 = vmatpush.xpose.msk.msra.mxu2 %vm358_vm0, %v430_v8 }
  0x33   : > { %2392 = vmatpush.xpose.msk.msra.mxu3 %vm358_vm0, %v430_v8 }
  0x36   : > { %2330 = vmatpush.xpose.msk.msra.mxu0 %vm358_vm0, %v429_v9  ;;  %2393 = vmatpush.xpose.msk.msra.mxu2 %vm358_vm0, %v429_v9 }
  0x37   : > { %2394 = vmatpush.xpose.msk.msra.mxu3 %vm358_vm0, %v429_v9 }
  0x3a   : > { %2331 = vmatpush.xpose.msk.msra.mxu0 %vm358_vm0, %v428_v10  ;;  %2395 = vmatpush.xpose.msk.msra.mxu2 %vm358_vm0, %v428_v10 }
  0x3b   : > { %2396 = vmatpush.xpose.msk.msra.mxu3 %vm358_vm0, %v428_v10 }
  0x3e   : > { %2332 = vmatpush.xpose.msk.msra.mxu0 %vm358_vm0, %v427_v11  ;;  %2397 = vmatpush.xpose.msk.msra.mxu2 %vm358_vm0, %v427_v11 }
  0x3f   : > { %2398 = vmatpush.xpose.msk.msra.mxu3 %vm358_vm0, %v427_v11 }
  0x42   : > { %2333 = vmatpush.xpose.msk.msra.mxu0 %vm358_vm0, %v426_v12  ;;  %2399 = vmatpush.xpose.msk.msra.mxu2 %vm358_vm0, %v426_v12 }
  0x43   : > { %2400 = vmatpush.xpose.msk.msra.mxu3 %vm358_vm0, %v426_v12 }
  0x46   : > { %2334 = vmatpush.xpose.msk.msra.mxu0 %vm358_vm0, %v425_v13  ;;  %2401 = vmatpush.xpose.msk.msra.mxu2 %vm358_vm0, %v425_v13 }
  0x47   : > { %2402 = vmatpush.xpose.msk.msra.mxu3 %vm358_vm0, %v425_v13 }
  0x4a   : > { %2335 = vmatpush.xpose.msk.msra.mxu0 %vm358_vm0, %v424_v14  ;;  %2403 = vmatpush.xpose.msk.msra.mxu2 %vm358_vm0, %v424_v14 }
  0x4b   : > { %2404 = vmatpush.xpose.msk.msra.mxu3 %vm358_vm0, %v424_v14 }
  0x4e   : > { %2336 = vmatpush.xpose.msk.msra.mxu0 %vm358_vm0, %v423_v15  ;;  %2405 = vmatpush.xpose.msk.msra.mxu2 %vm358_vm0, %v423_v15 }
  0x4f   : > { %2406 = vmatpush.xpose.msk.msra.mxu3 %vm358_vm0, %v423_v15 }
  0x51   : > { %2337 = vmatmul.msk.f32.vlgmr.msra.gmra.mxu0 %vm358_vm0, %v391_v16  ;;  %2350 = vmatmul.msk.f32.vlgmr.msra.gmra.mxu2 %vm358_vm0, %v404_v17 }
  0x52   : > { %2365 = vmatmul.msk.f32.vlgmr.msra.gmra.mxu3 %vm358_vm0, %v419_v18 }
  0x59   : > { %2338 = vmatmul.msk.f32.gmra.mxu0 %vm358_vm0, %v392_v19  ;;  %2351 = vmatmul.msk.f32.gmra.mxu2 %vm358_vm0, %v405_v20 }
  0x5a   : > { %2366 = vmatmul.msk.f32.gmra.mxu3 %vm358_vm0, %v420_v21 }
  0x61   : > { %2339 = vmatmul.msk.f32.gmra.mxu0 %vm358_vm0, %v393_v22  ;;  %2352 = vmatmul.msk.f32.gmra.mxu2 %vm358_vm0, %v406_v23 }
  0x62   : > { %2367 = vmatmul.msk.f32.gmra.mxu3 %vm358_vm0, %v421_v24 }
  0x69   : > { %2340 = vmatmul.msk.f32.gmra.mxu0 %vm358_vm0, %v394_v25  ;;  %2353 = vmatmul.msk.f32.gmra.mxu2 %vm358_vm0, %v407_v26 }
  0x6a   : > { %2368 = vmatmul.msk.f32.gmra.mxu3 %vm358_vm0, %v422_v27 }
  0x71   : > { %2341 = vmatmul.msk.f32.gmra.mxu0 %vm358_vm0, %v395_v28  ;;  %2354 = vmatmul.msk.f32.gmra.mxu2 %vm358_vm0, %v408_v29 }
  0x79   : > { %2355 = vmatmul.msk.f32.gmra.mxu2 %vm358_vm0, %v409_v30  ;;  %2342 = vmatmul.msk.f32.gmra.mxu0 %vm358_vm0, %v396_v31 }
  0x81   : > { %2356 = vmatmul.msk.f32.gmra.mxu2 %vm358_vm0, %v410_v32  ;;  %2343 = vmatmul.msk.f32.gmra.mxu0 %vm358_vm0, %v397_v33 }
  0x89   : > { %2357 = vmatmul.msk.f32.gmra.mxu2 %vm358_vm0, %v411_v34  ;;  %2344 = vmatmul.msk.f32.gmra.mxu0 %vm358_vm0, %v398_v35  ;;  %v2685_v35 = vmov -inf  }
  0x8a   : > { %294 = vst.msk [vmem:[#allocation2] sm:$0xff] %vm293_vm2, %v2685_v35 }
  0x8b   : > { %295 = vst.msk [vmem:[#allocation2 + $0x8] sm:$0xff] %vm293_vm2, %v2685_v35 }
  0x8c   : > { %296 = vst.msk [vmem:[#allocation2 + $0x10] sm:$0xff] %vm293_vm2, %v2685_v35 }
  0x8d   : > { %297 = vst.msk [vmem:[#allocation2 + $0x18] sm:$0xff] %vm293_vm2, %v2685_v35 }
  0x8e   : > { %298 = vst.msk [vmem:[#allocation2 + $0x20] sm:$0xff] %vm293_vm2, %v2685_v35 }
  0x8f   : > { %299 = vst.msk [vmem:[#allocation2 + $0x28] sm:$0xff] %vm293_vm2, %v2685_v35 }
  0x90   : > { %300 = vst.msk [vmem:[#allocation2 + $0x30] sm:$0xff] %vm293_vm2, %v2685_v35 }
  0x91   : > { %2358 = vmatmul.msk.f32.gmra.mxu2 %vm358_vm0, %v412_v36  ;;  %2345 = vmatmul.msk.f32.gmra.mxu0 %vm358_vm0, %v399_v37  ;;  %301 = vst.msk [vmem:[#allocation2 + $0x38] sm:$0xff] %vm293_vm2, %v2685_v35 }
  0x92   : > { %302 = vst.msk [vmem:[#allocation2 + $0x40] sm:$0xff] %vm293_vm2, %v2685_v35 }
  0x93   : > { %303 = vst.msk [vmem:[#allocation2 + $0x48] sm:$0xff] %vm293_vm2, %v2685_v35 }
  0x94   : > { %304 = vst.msk [vmem:[#allocation2 + $0x50] sm:$0xff] %vm293_vm2, %v2685_v35 }
  0x95   : > { %305 = vst.msk [vmem:[#allocation2 + $0x58] sm:$0xff] %vm293_vm2, %v2685_v35 }
  0x96   : > { %306 = vst.msk [vmem:[#allocation2 + $0x60] sm:$0xff] %vm293_vm2, %v2685_v35 }
  0x97   : > { %307 = vst.msk [vmem:[#allocation2 + $0x68] sm:$0xff] %vm293_vm2, %v2685_v35 }
  0x98   : > { %308 = vst.msk [vmem:[#allocation2 + $0x70] sm:$0xff] %vm293_vm2, %v2685_v35 }
  0x99   : > { %2359 = vmatmul.msk.f32.gmra.mxu2 %vm358_vm0, %v413_v38  ;;  %2346 = vmatmul.msk.f32.gmra.mxu0 %vm358_vm0, %v400_v39  ;;  %309 = vst.msk [vmem:[#allocation2 + $0x78] sm:$0xff] %vm293_vm2, %v2685_v35 }
  0x9a   : > { %310 = vst.msk [vmem:[#allocation2 + $0x80] sm:$0xff] %vm293_vm2, %v2685_v35 }
  0x9b   : > { %311 = vst.msk [vmem:[#allocation2 + $0x88] sm:$0xff] %vm293_vm2, %v2685_v35 }
  0x9c   : > { %312 = vst.msk [vmem:[#allocation2 + $0x90] sm:$0xff] %vm293_vm2, %v2685_v35 }
  0x9d   : > { %313 = vst.msk [vmem:[#allocation2 + $0x98] sm:$0xff] %vm293_vm2, %v2685_v35 }
  0x9e   : > { %314 = vst.msk [vmem:[#allocation2 + $0xa0] sm:$0xff] %vm293_vm2, %v2685_v35 }
  0x9f   : > { %315 = vst.msk [vmem:[#allocation2 + $0xa8] sm:$0xff] %vm293_vm2, %v2685_v35 }
  0xa0   : > { %316 = vst.msk [vmem:[#allocation2 + $0xb0] sm:$0xff] %vm293_vm2, %v2685_v35 }
  0xa1   : > { %2360 = vmatmul.msk.f32.gmra.mxu2 %vm358_vm0, %v414_v40  ;;  %2347 = vmatmul.msk.f32.gmra.mxu0 %vm358_vm0, %v401_v41  ;;  %317 = vst.msk [vmem:[#allocation2 + $0xb8] sm:$0xff] %vm293_vm2, %v2685_v35 }
  0xa2   : > { %318 = vst.msk [vmem:[#allocation2 + $0xc0] sm:$0xff] %vm293_vm2, %v2685_v35 }
  0xa3   : > { %319 = vst.msk [vmem:[#allocation2 + $0xc8] sm:$0xff] %vm293_vm2, %v2685_v35 }
  0xa4   : > { %320 = vst.msk [vmem:[#allocation2 + $0xd0] sm:$0xff] %vm293_vm2, %v2685_v35 }
  0xa5   : > { %321 = vst.msk [vmem:[#allocation2 + $0xd8] sm:$0xff] %vm293_vm2, %v2685_v35 }
  0xa6   : > { %322 = vst.msk [vmem:[#allocation2 + $0xe0] sm:$0xff] %vm293_vm2, %v2685_v35 }
  0xa7   : > { %323 = vst.msk [vmem:[#allocation2 + $0xe8] sm:$0xff] %vm293_vm2, %v2685_v35 }
  0xa8   : > { %324 = vst.msk [vmem:[#allocation2 + $0xf0] sm:$0xff] %vm293_vm2, %v2685_v35 }
  0xa9   : > { %2361 = vmatmul.msk.f32.gmra.mxu2 %vm358_vm0, %v415_v42  ;;  %2348 = vmatmul.msk.f32.gmra.mxu0 %vm358_vm0, %v402_v43  ;;  %v2686_v43 = vmov 0   ;;  %325 = vst.msk [vmem:[#allocation2 + $0xf8] sm:$0xff] %vm293_vm2, %v2685_v35 }
  0xaa   : > { %2467 = vset.pattern.permute.xlu1 %v2686_v43  ;;  %2466 = vset.pattern.permute.xlu2 %v2686_v43 }
  0xab   : > { %2468 = vset.pattern.permute.xlu0 %v2686_v43 }
  0xb1   : > { %2362 = vmatmul.msk.f32.gmra.mxu2 %vm358_vm0, %v416_v44  ;;  %2349 = vmatmul.msk.f32.gmra.mxu0 %vm358_vm0, %v403_v45 }
  0xb9   : > { %2363 = vmatmul.msk.f32.gmra.mxu2 %vm358_vm0, %v417_v46 }
  0xc1   : > { %2364 = vmatmul.msk.f32.gmra.mxu2 %vm358_vm0, %v418_v47 }
  0xce   : > { %v617_v50 = vpop.f32.mrf.mxu0 }
  0xcf   : > { %v2877_v51 = vsel %vm718_vm1, %v617_v50, -inf }
  0xd0   : > { %785 = vmax.xlane.f32.xlu0 %v2877_v51 }
  0xd4   : > { %v656_v52 = vpop.f32.mrf.mxu2 }
  0xd5   : > { %v2882_v53 = vsel %vm718_vm1, %v656_v52, -inf  ;;  %v701_v56 = vpop.f32.mrf.mxu3  ;;  %v753_v52 = vld [vmem:[#allocation2] sm:$0xff] }
  0xd6   : > { %811 = vmax.xlane.f32.xlu1 %v2882_v53  ;;  %v620_v54 = vpop.f32.mrf.mxu0  ;;  %v2892_v57 = vsel %vm718_vm1, %v701_v56, -inf }
  0xd7   : > { %v2887_v55 = vsel %vm718_vm1, %v620_v54, -inf  ;;  %v2687_v54 = vmov 0.0  }
  0xd8   : > { %787 = vmax.xlane.f32.xlu0 %v2887_v55  ;;  %360 = vst.msk [vmem:[#allocation4 + $0x8] sm:$0xff] %vm358_vm0, %v2687_v54 }
  0xd9   : > { %326 = vst.msk [vmem:[#allocation3] sm:$0xff] %vm293_vm2, %v2687_v54 }
  0xda   : > { %327 = vst.msk [vmem:[#allocation3 + $0x8] sm:$0xff] %vm293_vm2, %v2687_v54 }
  0xdb   : > { %328 = vst.msk [vmem:[#allocation3 + $0x10] sm:$0xff] %vm293_vm2, %v2687_v54 }
  0xdc   : > { %v659_v58 = vpop.f32.mrf.mxu2  ;;  %329 = vst.msk [vmem:[#allocation3 + $0x18] sm:$0xff] %vm293_vm2, %v2687_v54 }
  0xdd   : > { %v2896_v59 = vsel %vm718_vm1, %v659_v58, -inf  ;;  %v704_v61 = vpop.f32.mrf.mxu3  ;;  %330 = vst.msk [vmem:[#allocation3 + $0x20] sm:$0xff] %vm293_vm2, %v2687_v54 }
  0xde   : > { %841 = vmax.xlane.f32.xlu1 %v2892_v57  ;;  %813 = vmax.xlane.f32.xlu2 %v2896_v59  ;;  %v623_v60 = vpop.f32.mrf.mxu0  ;;  %v2906_v0 = vsel %vm718_vm1, %v704_v61, -inf  ;;  %331 = vst.msk [vmem:[#allocation3 + $0x28] sm:$0xff] %vm293_vm2, %v2687_v54 }
  0xdf   : > { %v2902_v62 = vsel %vm718_vm1, %v623_v60, -inf  ;;  %332 = vst.msk [vmem:[#allocation3 + $0x30] sm:$0xff] %vm293_vm2, %v2687_v54 }
  0xe0   : > { %333 = vst.msk [vmem:[#allocation3 + $0x38] sm:$0xff] %vm293_vm2, %v2687_v54 }
  0xe1   : > { %334 = vst.msk [vmem:[#allocation3 + $0x40] sm:$0xff] %vm293_vm2, %v2687_v54 }
  0xe2   : > { %335 = vst.msk [vmem:[#allocation3 + $0x48] sm:$0xff] %vm293_vm2, %v2687_v54 }
  0xe3   : > { %336 = vst.msk [vmem:[#allocation3 + $0x50] sm:$0xff] %vm293_vm2, %v2687_v54 }
  0xe4   : > { %v662_v63 = vpop.f32.mrf.mxu2  ;;  %337 = vst.msk [vmem:[#allocation3 + $0x58] sm:$0xff] %vm293_vm2, %v2687_v54 }
  0xe5   : > { %v2910_v1 = vsel %vm718_vm1, %v662_v63, -inf  ;;  %v707_v3 = vpop.f32.mrf.mxu3  ;;  %v3076_v63 = vld [vmem:[#allocation2 + $0x68] sm:$0xff]  ;;  %338 = vst.msk [vmem:[#allocation3 + $0x60] sm:$0xff] %vm293_vm2, %v2687_v54 }
  0xe6   : > { %815 = vmax.xlane.f32.xlu0 %v2910_v1  ;;  %789 = vmax.xlane.f32.xlu1 %v2902_v62  ;;  %v626_v2 = vpop.f32.mrf.mxu0  ;;  %v2921_v5 = vsel %vm718_vm1, %v707_v3, -inf  ;;  %v754_v3 = vld [vmem:[#allocation2 + $0x8] sm:$0xff]  ;;  %339 = vst.msk [vmem:[#allocation3 + $0x68] sm:$0xff] %vm293_vm2, %v2687_v54 }
  0xe7   : > { %843 = vmax.xlane.f32.xlu2 %v2906_v0  ;;  %v2917_v4 = vsel %vm718_vm1, %v626_v2, -inf  ;;  %340 = vst.msk [vmem:[#allocation3 + $0x70] sm:$0xff] %vm293_vm2, %v2687_v54 }
  0xe8   : > { %341 = vst.msk [vmem:[#allocation3 + $0x78] sm:$0xff] %vm293_vm2, %v2687_v54 }
  0xe9   : > { %342 = vst.msk [vmem:[#allocation3 + $0x80] sm:$0xff] %vm293_vm2, %v2687_v54 }
  0xea   : > { %343 = vst.msk [vmem:[#allocation3 + $0x88] sm:$0xff] %vm293_vm2, %v2687_v54 }
  0xeb   : > { %344 = vst.msk [vmem:[#allocation3 + $0x90] sm:$0xff] %vm293_vm2, %v2687_v54 }
  0xec   : > { %v665_v6 = vpop.f32.mrf.mxu2  ;;  %345 = vst.msk [vmem:[#allocation3 + $0x98] sm:$0xff] %vm293_vm2, %v2687_v54 }
  0xed   : > { %v2932_v10 = vsel %vm718_vm1, %v665_v6, -inf  ;;  %v710_v13 = vpop.f32.mrf.mxu3  ;;  %346 = vst.msk [vmem:[#allocation3 + $0xa0] sm:$0xff] %vm293_vm2, %v2687_v54 }
  0xee   : > { %791 = vmax.xlane.f32.xlu1 %v2917_v4  ;;  %v629_v7 = vpop.f32.mrf.mxu0  ;;  %845 = vmax.xlane.f32.xlu0 %v2921_v5  ;;  %v2942_v14 = vsel %vm718_vm1, %v710_v13, -inf  ;;  %v3099_v13 = vld [vmem:[#allocation2 + $0x70] sm:$0xff]  ;;  %347 = vst.msk [vmem:[#allocation3 + $0xa8] sm:$0xff] %vm293_vm2, %v2687_v54 }
  0xef   : > { %v2927_v8 = vsel %vm718_vm1, %v629_v7, -inf  ;;  %348 = vst.msk [vmem:[#allocation3 + $0xb0] sm:$0xff] %vm293_vm2, %v2687_v54 }
  0xf0   : > { %793 = vmax.xlane.f32.xlu2 %v2927_v8  ;;  %349 = vst.msk [vmem:[#allocation3 + $0xb8] sm:$0xff] %vm293_vm2, %v2687_v54 }
  0xf1   : > { %350 = vst.msk [vmem:[#allocation3 + $0xc0] sm:$0xff] %vm293_vm2, %v2687_v54 }
  0xf2   : > { %351 = vst.msk [vmem:[#allocation3 + $0xc8] sm:$0xff] %vm293_vm2, %v2687_v54 }
  0xf3   : > { %352 = vst.msk [vmem:[#allocation3 + $0xd0] sm:$0xff] %vm293_vm2, %v2687_v54 }
  0xf4   : > { %v668_v9 = vpop.f32.mrf.mxu2  ;;  %353 = vst.msk [vmem:[#allocation3 + $0xd8] sm:$0xff] %vm293_vm2, %v2687_v54 }
  0xf5   : > { %v2937_v12 = vsel %vm718_vm1, %v668_v9, -inf  ;;  %354 = vst.msk [vmem:[#allocation3 + $0xe0] sm:$0xff] %vm293_vm2, %v2687_v54 }
  0xf6   : > { %817 = vmax.xlane.f32.xlu1 %v2932_v10  ;;  %v632_v11 = vpop.f32.mrf.mxu0  ;;  %355 = vst.msk [vmem:[#allocation3 + $0xe8] sm:$0xff] %vm293_vm2, %v2687_v54 }
  0xf7   : > { %v2950_v17 = vsel %vm718_vm1, %v632_v11, -inf  ;;  %v3097_v11 = vld [vmem:[#allocation2 + $0xe0] sm:$0xff]  ;;  %356 = vst.msk [vmem:[#allocation3 + $0xf0] sm:$0xff] %vm293_vm2, %v2687_v54 }
  0xf8   : > { %819 = vmax.xlane.f32.xlu2 %v2937_v12  ;;  %357 = vst.msk [vmem:[#allocation3 + $0xf8] sm:$0xff] %vm293_vm2, %v2687_v54 }
  0xf9   : > { %359 = vst.msk [vmem:[#allocation4] sm:$0xff] %vm358_vm0, %v2687_v54 }
  0xfa   : > { %361 = vst.msk [vmem:[#allocation4 + $0x10] sm:$0xff] %vm358_vm0, %v2687_v54 }
  0xfb   : > { %362 = vst.msk [vmem:[#allocation4 + $0x18] sm:$0xff] %vm358_vm0, %v2687_v54 }
  0xfc   : > { %v671_v15 = vpop.f32.mrf.mxu2  ;;  %363 = vst.msk [vmem:[#allocation4 + $0x20] sm:$0xff] %vm358_vm0, %v2687_v54 }
  0xfd   : > { %v2946_v16 = vsel %vm718_vm1, %v671_v15, -inf  ;;  %364 = vst.msk [vmem:[#allocation4 + $0x28] sm:$0xff] %vm358_vm0, %v2687_v54 }
  0xfe   : > { %821 = vmax.xlane.f32.xlu0 %v2946_v16  ;;  %847 = vmax.xlane.f32.xlu1 %v2942_v14  ;;  %v635_v18 = vpop.f32.mrf.mxu0  ;;  %365 = vst.msk [vmem:[#allocation4 + $0x30] sm:$0xff] %vm358_vm0, %v2687_v54 }
  0xff   : > { %v2957_v19 = vsel %vm718_vm1, %v635_v18, -inf  ;;  %366 = vst.msk [vmem:[#allocation4 + $0x38] sm:$0xff] %vm358_vm0, %v2687_v54 }
 0x100   : > { %795 = vmax.xlane.f32.xlu2 %v2950_v17  ;;  %367 = vst.msk [vmem:[#allocation4 + $0x40] sm:$0xff] %vm358_vm0, %v2687_v54 }
 0x101   : > { %368 = vst.msk [vmem:[#allocation4 + $0x48] sm:$0xff] %vm358_vm0, %v2687_v54 }
 0x102   : > { %369 = vst.msk [vmem:[#allocation4 + $0x50] sm:$0xff] %vm358_vm0, %v2687_v54 }
 0x103   : > { %370 = vst.msk [vmem:[#allocation4 + $0x58] sm:$0xff] %vm358_vm0, %v2687_v54 }
 0x104   : > { %v674_v20 = vpop.f32.mrf.mxu2  ;;  %371 = vst.msk [vmem:[#allocation4 + $0x60] sm:$0xff] %vm358_vm0, %v2687_v54 }
 0x105   : > { %v2961_v21 = vsel %vm718_vm1, %v674_v20, -inf  ;;  %372 = vst.msk [vmem:[#allocation4 + $0x68] sm:$0xff] %vm358_vm0, %v2687_v54 }
 0x106   : > { %823 = vmax.xlane.f32.xlu1 %v2961_v21  ;;  %797 = vmax.xlane.f32.xlu0 %v2957_v19  ;;  %v638_v22 = vpop.f32.mrf.mxu0  ;;  %373 = vst.msk [vmem:[#allocation4 + $0x70] sm:$0xff] %vm358_vm0, %v2687_v54 }
 0x107   : > { %v2967_v23 = vsel %vm718_vm1, %v638_v22, -inf  ;;  %374 = vst.msk [vmem:[#allocation4 + $0x78] sm:$0xff] %vm358_vm0, %v2687_v54 }
 0x108   : > { %375 = vst.msk [vmem:[#allocation4 + $0x80] sm:$0xff] %vm358_vm0, %v2687_v54 }
 0x109   : > { %376 = vst.msk [vmem:[#allocation4 + $0x88] sm:$0xff] %vm358_vm0, %v2687_v54 }
 0x10a   : > { %377 = vst.msk [vmem:[#allocation4 + $0x90] sm:$0xff] %vm358_vm0, %v2687_v54 }
 0x10b   : > { %378 = vst.msk [vmem:[#allocation4 + $0x98] sm:$0xff] %vm358_vm0, %v2687_v54 }
 0x10c   : > { %v677_v24 = vpop.f32.mrf.mxu2  ;;  %379 = vst.msk [vmem:[#allocation4 + $0xa0] sm:$0xff] %vm358_vm0, %v2687_v54 }
 0x10d   : > { %v2971_v25 = vsel %vm718_vm1, %v677_v24, -inf  ;;  %380 = vst.msk [vmem:[#allocation4 + $0xa8] sm:$0xff] %vm358_vm0, %v2687_v54 }
 0x10e   : > { %825 = vmax.xlane.f32.xlu2 %v2971_v25  ;;  %799 = vmax.xlane.f32.xlu1 %v2967_v23  ;;  %v641_v26 = vpop.f32.mrf.mxu0  ;;  %381 = vst.msk [vmem:[#allocation4 + $0xb0] sm:$0xff] %vm358_vm0, %v2687_v54 }
 0x10f   : > { %v2977_v27 = vsel %vm718_vm1, %v641_v26, -inf  ;;  %382 = vst.msk [vmem:[#allocation4 + $0xb8] sm:$0xff] %vm358_vm0, %v2687_v54 }
 0x110   : > { %383 = vst.msk [vmem:[#allocation4 + $0xc0] sm:$0xff] %vm358_vm0, %v2687_v54 }
 0x111   : > { %384 = vst.msk [vmem:[#allocation4 + $0xc8] sm:$0xff] %vm358_vm0, %v2687_v54 }
 0x112   : > { %385 = vst.msk [vmem:[#allocation4 + $0xd0] sm:$0xff] %vm358_vm0, %v2687_v54 }
 0x113   : > { %386 = vst.msk [vmem:[#allocation4 + $0xd8] sm:$0xff] %vm358_vm0, %v2687_v54 }
 0x114   : > { %v680_v28 = vpop.f32.mrf.mxu2  ;;  %387 = vst.msk [vmem:[#allocation4 + $0xe0] sm:$0xff] %vm358_vm0, %v2687_v54 }
 0x115   : > { %v2981_v29 = vsel %vm718_vm1, %v680_v28, -inf  ;;  %388 = vst.msk [vmem:[#allocation4 + $0xe8] sm:$0xff] %vm358_vm0, %v2687_v54 }
 0x116   : > { %827 = vmax.xlane.f32.xlu0 %v2981_v29  ;;  %801 = vmax.xlane.f32.xlu2 %v2977_v27  ;;  %v644_v30 = vpop.f32.mrf.mxu0  ;;  %389 = vst.msk [vmem:[#allocation4 + $0xf0] sm:$0xff] %vm358_vm0, %v2687_v54 }
 0x117   : > { %v2987_v31 = vsel %vm718_vm1, %v644_v30, -inf  ;;  %v3124_v30 = vld [vmem:[#allocation2 + $0x78] sm:$0xff]  ;;  %390 = vst.msk [vmem:[#allocation4 + $0xf8] sm:$0xff] %vm358_vm0, %v2687_v54  ;;  %v443_v54 = vld [vmem:[%s3339_s26 + $0x20] sm:$0xff] }
 0x11c   : > { %v683_v32 = vpop.f32.mrf.mxu2 }
 0x11d   : > { %v2991_v33 = vsel %vm718_vm1, %v683_v32, -inf  ;;  %v3126_v32 = vld [vmem:[#allocation2 + $0x10] sm:$0xff] }
 0x11e   : > { %829 = vmax.xlane.f32.xlu1 %v2991_v33  ;;  %803 = vmax.xlane.f32.xlu0 %v2987_v31  ;;  %v647_v34 = vpop.f32.mrf.mxu0 }
 0x11f   : > { %v2998_v36 = vsel %vm718_vm1, %v647_v34, -inf  ;;  %v3130_v34 = vld [vmem:[#allocation2 + $0xe8] sm:$0xff] }
 0x124   : > { %v686_v37 = vpop.f32.mrf.mxu2 }
 0x125   : > { %v3004_v38 = vsel %vm718_vm1, %v686_v37, -inf }
 0x126   : > { %831 = vmax.xlane.f32.xlu2 %v3004_v38  ;;  %805 = vmax.xlane.f32.xlu1 %v2998_v36  ;;  %v650_v39 = vpop.f32.mrf.mxu0 }
 0x127   : > { %v3016_v40 = vsel %vm718_vm1, %v650_v39, -inf }
 0x128   : > { %4093 = vst [vmem:[#allocation5_spill] sm:$0xff] %v3016_v40 }
 0x12c   : > { %v689_v41 = vpop.f32.mrf.mxu2 }
 0x12d   : > { %v3022_v42 = vsel %vm718_vm1, %v689_v41, -inf }
 0x12e   : > { %833 = vmax.xlane.f32.xlu0 %v3022_v42  ;;  %807 = vmax.xlane.f32.xlu2 %v3016_v40  ;;  %v653_v44 = vpop.f32.mrf.mxu0 }
 0x12f   : > { %v3034_v45 = vsel %vm718_vm1, %v653_v44, -inf }
 0x130   : > { %4094 = vst [vmem:[#allocation6_spill] sm:$0xff] %v3034_v45 }
 0x134   : > { %v692_v46 = vpop.f32.mrf.mxu2 }
 0x135   : > { %v3040_v47 = vsel %vm718_vm1, %v692_v46, -inf }
 0x136   : > { %4095 = vst [vmem:[#allocation7_spill] sm:$0xff] %v3040_v47  ;;  %835 = vmax.xlane.f32.xlu1 %v3040_v47  ;;  %809 = vmax.xlane.f32.xlu0 %v3034_v45  ;;  %v444_v47 = vld [vmem:[%s3339_s26 + $0x28] sm:$0xff]  ;;  %v441_v45 = vld [vmem:[%s3339_s26 + $0x10] sm:$0xff] }
 0x13c   : > { %v695_v48 = vpop.f32.mrf.mxu2 }
 0x13d   : > { %v3054_v50 = vsel %vm718_vm1, %v695_v48, -inf }
 0x13e   : > { %4096 = vst [vmem:[#allocation8_spill] sm:$0xff] %v3054_v50  ;;  %837 = vmax.xlane.f32.xlu2 %v3054_v50 }
 0x143   : > { %v786_v56 = vpop.xlane.xlu0 %785 }
 0x144   : > { %v698_v58 = vpop.f32.mrf.mxu2  ;;  %v849_v60 = vmax.f32 %v753_v52, %v786_v56  ;;  %v3165_v56 = vld [vmem:[#allocation2 + $0xf0] sm:$0xff] }
 0x145   : > { %v3070_v61 = vsel %vm718_vm1, %v698_v58, -inf }
 0x146   : > { %4097 = vst [vmem:[#allocation9_spill] sm:$0xff] %v3070_v61  ;;  %839 = vmax.xlane.f32.xlu0 %v3070_v61  ;;  %v881_v15 = vsub.f32 %v753_v52, %v849_v60  ;;  %v3161_v52 = vld [vmem:[#allocation2 + $0x18] sm:$0xff]  ;;  %v448_v61 = vld [vmem:[%s3339_s26 + $0x48] sm:$0xff] }
 0x147   : > { %1827 = vst.msk [vmem:[#allocation2] sm:$0xff] %vm293_vm2, %v849_v60 }
 0x148   : > { %v913_v28 = vmul.f32 1.442695, %v881_v15 }
 0x149   : > { %v812_v2 = vpop.xlane.xlu1 %811 }
 0x14a   : > { %v3085_v49 = vmax.f32 %v3076_v63, %v812_v2 }
 0x14b   : > { %v788_v6 = vpop.xlane.xlu0 %787 }
 0x14c   : > { %1840 = vst.msk [vmem:[#allocation2 + $0x68] sm:$0xff] %vm293_vm2, %v3085_v49  ;;  %v850_v7 = vmax.f32 %v754_v3, %v788_v6  ;;  %v894_v6 = vsub.f32 %v3076_v63, %v3085_v49 }
 0x14e   : > { %v882_v9 = vsub.f32 %v754_v3, %v850_v7  ;;  %1828 = vst.msk [vmem:[#allocation2 + $0x8] sm:$0xff] %vm293_vm2, %v850_v7  ;;  %v939_v63 = vmul.f32 1.442695, %v894_v6 }
 0x14f   : > { %1044 = vperm.xlu1 %2467, %v3085_v49   ;;  %v3197_v49 = vld [vmem:[#allocation2 + $0x80] sm:$0xff] }
 0x150   : > { %v915_v18 = vmul.f32 1.442695, %v882_v9 }
 0x151   : > { %v842_v20 = vpop.xlane.xlu1 %841  ;;  %v814_v22 = vpop.xlane.xlu2 %813 }
 0x152   : > { %v3108_v24 = vmax.f32 %v3097_v11, %v842_v20  ;;  %v3111_v26 = vmax.f32 %v3099_v13, %v814_v22  ;;  %2469 = vpow2.f32 %v915_v18  ;;  %v3203_v20 = vld [vmem:[#allocation2 + $0x88] sm:$0xff] }
 0x153   : > { %2471 = vpow2.f32 %v913_v28 }
 0x154   : > { %1855 = vst.msk [vmem:[#allocation2 + $0xe0] sm:$0xff] %vm293_vm2, %v3108_v24  ;;  %2473 = vpow2.f32 %v939_v63  ;;  %v909_v28 = vsub.f32 %v3097_v11, %v3108_v24  ;;  %v895_v11 = vsub.f32 %v3099_v13, %v3111_v26  ;;  %v3242_v13 = vld [vmem:[#allocation2 + $0x28] sm:$0xff] }
 0x155   : > { %1841 = vst.msk [vmem:[#allocation2 + $0x70] sm:$0xff] %vm293_vm2, %v3111_v26 }
 0x156   : > { %979 = vperm.xlu2 %2466, %v849_v60   ;;  %v3169_v60 = vld [vmem:[#allocation2 + $0x20] sm:$0xff] }
 0x157   : > { %1119 = vperm.xlu1 %2467, %v3108_v24   ;;  %v3230_v24 = vld [vmem:[#allocation2 + $0x90] sm:$0xff] }
 0x158   : > { %v3144_v44 = vpop.eup %2469 }
 0x159   : > { %v816_v35 = vpop.xlane.xlu0 %815  ;;  %v790_v37 = vpop.xlane.xlu1 %789  ;;  %4098 = vst [vmem:[#allocation10_spill] sm:$0xff] %v3144_v44 }
 0x15a   : > { %v3137_v39 = vmax.f32 %v3124_v30, %v816_v35  ;;  %v3140_v41 = vmax.f32 %v3126_v32, %v790_v37  ;;  %984 = vperm.xlu0 %2468, %v850_v7   ;;  %v844_v43 = vpop.xlane.xlu2 %843  ;;  %v3155_v48 = vpop.eup %2471 }
 0x15b   : > { %v3147_v46 = vmax.f32 %v3130_v34, %v844_v43  ;;  %4099 = vst [vmem:[#allocation11_spill] sm:$0xff] %v3155_v48  ;;  %v969_v43 = vmul.f32 1.442695, %v909_v28  ;;  %v3240_v6 = vpop.eup %2473 }
 0x15c   : > { %1842 = vst.msk [vmem:[#allocation2 + $0x78] sm:$0xff] %vm293_vm2, %v3137_v39 }
 0x15d   : > { %1829 = vst.msk [vmem:[#allocation2 + $0x10] sm:$0xff] %vm293_vm2, %v3140_v41  ;;  %2475 = vpow2.f32 %v969_v43  ;;  %v3272_v43 = vld [vmem:[#allocation2 + $0x98] sm:$0xff] }
 0x15e   : > { %1856 = vst.msk [vmem:[#allocation2 + $0xe8] sm:$0xff] %vm293_vm2, %v3147_v46  ;;  %1465 = vperm.xlu2 %2466, %v3144_v44   ;;  %v452_v44 = vld [vmem:[%s3339_s26 + $0x68] sm:$0xff] }
 0x15f   : > { %1460 = vperm.xlu1 %2467, %v3155_v48   ;;  %4100 = vst [vmem:[#allocation12_spill] sm:$0xff] %v3240_v6 }
 0x161   : > { %v792_v58 = vpop.xlane.xlu1 %791  ;;  %v846_v3 = vpop.xlane.xlu0 %845 }
 0x162   : > { %v3174_v2 = vmax.f32 %v3161_v52, %v792_v58  ;;  %1049 = vperm.xlu0 %2468, %v3111_v26   ;;  %v3182_v9 = vmax.f32 %v3165_v56, %v846_v3  ;;  %v896_v58 = vsub.f32 %v3124_v30, %v3137_v39  ;;  %v3236_v3 = vld [vmem:[#allocation2 + $0xf8] sm:$0xff]  ;;  %v941_v30 = vmul.f32 1.442695, %v895_v11  ;;  %v3274_v11 = vld [vmem:[#allocation2 + $0x30] sm:$0xff] }
 0x163   : > { %v794_v7 = vpop.xlane.xlu2 %793 }
 0x164   : > { %1830 = vst.msk [vmem:[#allocation2 + $0x18] sm:$0xff] %vm293_vm2, %v3174_v2  ;;  %v3189_v15 = vmax.f32 %v3169_v60, %v794_v7  ;;  %2477 = vpow2.f32 %v941_v30 }
 0x165   : > { %1857 = vst.msk [vmem:[#allocation2 + $0xf0] sm:$0xff] %vm293_vm2, %v3182_v9 }
 0x166   : > { %1831 = vst.msk [vmem:[#allocation2 + $0x20] sm:$0xff] %vm293_vm2, %v3189_v15  ;;  %1054 = vperm.xlu2 %2466, %v3137_v39   ;;  %v883_v39 = vsub.f32 %v3126_v32, %v3140_v41 }
 0x167   : > { %989 = vperm.xlu1 %2467, %v3140_v41   ;;  %v910_v41 = vsub.f32 %v3130_v34, %v3147_v46 }
 0x168   : > { %v917_v32 = vmul.f32 1.442695, %v883_v39 }
 0x169   : > { %v818_v18 = vpop.xlane.xlu1 %817 }
 0x16a   : > { %v3208_v22 = vmax.f32 %v3197_v49, %v818_v18  ;;  %1124 = vperm.xlu0 %2468, %v3147_v46  }
 0x16b   : > { %v820_v35 = vpop.xlane.xlu2 %819 }
 0x16c   : > { %1843 = vst.msk [vmem:[#allocation2 + $0x80] sm:$0xff] %vm293_vm2, %v3208_v22  ;;  %v3220_v37 = vmax.f32 %v3203_v20, %v820_v35  ;;  %v943_v35 = vmul.f32 1.442695, %v896_v58  ;;  %v911_v58 = vsub.f32 %v3165_v56, %v3182_v9  ;;  %v971_v56 = vmul.f32 1.442695, %v910_v41  ;;  %v3311_v41 = vld [vmem:[#allocation2 + $0x38] sm:$0xff] }
 0x16e   : > { %1844 = vst.msk [vmem:[#allocation2 + $0x88] sm:$0xff] %vm293_vm2, %v3220_v37  ;;  %1129 = vperm.xlu2 %2466, %v3182_v9   ;;  %2479 = vpow2.f32 %v943_v35  ;;  %v973_v9 = vmul.f32 1.442695, %v911_v58  ;;  %v884_v58 = vsub.f32 %v3161_v52, %v3174_v2  ;;  %v897_v52 = vsub.f32 %v3197_v49, %v3208_v22 }
 0x16f   : > { %1059 = vperm.xlu1 %2467, %v3208_v22   ;;  %2481 = vpow2.f32 %v917_v32  ;;  %v3309_v32 = vld [vmem:[#allocation2 + $0xa0] sm:$0xff]  ;;  %v454_v22 = vld [vmem:[%s3339_s26 + $0x78] sm:$0xff] }
 0x170   : > { %2483 = vpow2.f32 %v971_v56  ;;  %1650 = vmatpush.msrb.mxu0 %v454_v22  ;;  %2407 = vmatpush.msra.mxu1 %v454_v22 }
 0x171   : > { %v822_v7 = vpop.xlane.xlu0 %821  ;;  %v848_v63 = vpop.xlane.xlu1 %847  ;;  %2485 = vpow2.f32 %v973_v9  ;;  %2408 = vmatpush.msrb.mxu3 %v454_v22 }
 0x172   : > { %v3247_v26 = vmax.f32 %v3230_v24, %v822_v7  ;;  %1525 = vperm.xlu0 %2468, %v3240_v6   ;;  %v3255_v18 = vmax.f32 %v3236_v3, %v848_v63  ;;  %v3282_v63 = vpop.eup %2475 }
 0x173   : > { %v796_v28 = vpop.xlane.xlu2 %795  ;;  %4101 = vst [vmem:[#allocation13_spill] sm:$0xff] %v3282_v63 }
 0x174   : > { %1845 = vst.msk [vmem:[#allocation2 + $0x90] sm:$0xff] %vm293_vm2, %v3247_v26  ;;  %v3262_v7 = vmax.f32 %v3242_v13, %v796_v28  ;;  %v3299_v28 = vpop.eup %2477  ;;  %v912_v22 = vsub.f32 %v3236_v3, %v3255_v18  ;;  %v450_v3 = vld [vmem:[%s3339_s26 + $0x58] sm:$0xff] }
 0x175   : > { %1858 = vst.msk [vmem:[#allocation2 + $0xf8] sm:$0xff] %vm293_vm2, %v3255_v18  ;;  %v3303_v35 = vpop.eup %2479 }
 0x176   : > { %994 = vperm.xlu2 %2466, %v3174_v2   ;;  %1832 = vst.msk [vmem:[#allocation2 + $0x28] sm:$0xff] %vm293_vm2, %v3262_v7  ;;  %v919_v2 = vmul.f32 1.442695, %v884_v58  ;;  %v3356_v58 = vld [vmem:[#allocation2 + $0xa8] sm:$0xff] }
 0x177   : > { %1134 = vperm.xlu1 %2467, %v3255_v18   ;;  %4102 = vst [vmem:[#allocation14_spill] sm:$0xff] %v3299_v28  ;;  %v975_v18 = vmul.f32 1.442695, %v912_v22 }
 0x178   : > { %4103 = vst [vmem:[#allocation15_spill] sm:$0xff] %v3303_v35  ;;  %2487 = vpow2.f32 %v919_v2 }
 0x179   : > { %v824_v30 = vpop.xlane.xlu1 %823  ;;  %v798_v34 = vpop.xlane.xlu0 %797 }
 0x17a   : > { %v3287_v46 = vmax.f32 %v3272_v43, %v824_v30  ;;  %1600 = vperm.xlu0 %2468, %v3282_v63   ;;  %v3291_v39 = vmax.f32 %v3274_v11, %v798_v34  ;;  %v3319_v30 = vpop.eup %2481 }
 0x17b   : > { %4104 = vst [vmem:[#allocation16_spill] sm:$0xff] %v3319_v30  ;;  %v3345_v9 = vpop.eup %2483 }
 0x17c   : > { %1846 = vst.msk [vmem:[#allocation2 + $0x98] sm:$0xff] %vm293_vm2, %v3287_v46  ;;  %v3349_v49 = vpop.eup %2485 }
 0x17d   : > { %1833 = vst.msk [vmem:[#allocation2 + $0x30] sm:$0xff] %vm293_vm2, %v3291_v39 }
 0x17e   : > { %1530 = vperm.xlu2 %2466, %v3299_v28   ;;  %4105 = vst [vmem:[#allocation17_spill] sm:$0xff] %v3345_v9 }
 0x17f   : > { %1535 = vperm.xlu1 %2467, %v3303_v35   ;;  %4106 = vst [vmem:[#allocation18_spill] sm:$0xff] %v3349_v49 }
 0x181   : > { %v826_v34 = vpop.xlane.xlu2 %825  ;;  %v800_v56 = vpop.xlane.xlu1 %799 }
 0x182   : > { %v3324_v35 = vmax.f32 %v3309_v32, %v826_v34  ;;  %1470 = vperm.xlu0 %2468, %v3319_v30   ;;  %v3328_v63 = vmax.f32 %v3311_v41, %v800_v56  ;;  %v945_v34 = vmul.f32 1.442695, %v897_v52  ;;  %v3358_v56 = vld [vmem:[#allocation2 + $0x40] sm:$0xff]  ;;  %v453_v30 = vld [vmem:[%s3339_s26 + $0x70] sm:$0xff] }
 0x183   : > { %1651 = vmatpush.msrb.mxu0 %v453_v30  ;;  %2409 = vmatpush.msra.mxu1 %v453_v30 }
 0x184   : > { %1847 = vst.msk [vmem:[#allocation2 + $0xa0] sm:$0xff] %vm293_vm2, %v3324_v35  ;;  %2489 = vpow2.f32 %v945_v34  ;;  %2410 = vmatpush.msrb.mxu3 %v453_v30  ;;  %v3386_v34 = vpop.eup %2487  ;;  %v3393_v30 = vld [vmem:[#allocation2 + $0xb0] sm:$0xff] }
 0x185   : > { %1834 = vst.msk [vmem:[#allocation2 + $0x38] sm:$0xff] %vm293_vm2, %v3328_v63  ;;  %1652 = vmatpush.msrb.mxu0 %v452_v44  ;;  %2411 = vmatpush.msra.mxu1 %v452_v44  ;;  %2491 = vpow2.f32 %v975_v18  ;;  %v3432_v18 = vld [vmem:[#allocation2 + $0xb8] sm:$0xff] }
 0x186   : > { %1605 = vperm.xlu2 %2466, %v3345_v9   ;;  %2412 = vmatpush.msrb.mxu3 %v452_v44  ;;  %4107 = vst [vmem:[#allocation19_spill] sm:$0xff] %v3386_v34  ;;  %v449_v44 = vld [vmem:[%s3339_s26 + $0x50] sm:$0xff] }
 0x187   : > { %1610 = vperm.xlu1 %2467, %v3349_v49  }
 0x189   : > { %v828_v9 = vpop.xlane.xlu0 %827  ;;  %v802_v52 = vpop.xlane.xlu2 %801 }
 0x18a   : > { %v3368_v49 = vmax.f32 %v3356_v58, %v828_v9  ;;  %1064 = vperm.xlu0 %2468, %v3220_v37   ;;  %v3372_v2 = vmax.f32 %v3358_v56, %v802_v52  ;;  %v451_v9 = vld [vmem:[%s3339_s26 + $0x60] sm:$0xff]  ;;  %v3395_v52 = vld [vmem:[#allocation2 + $0x48] sm:$0xff]  ;;  %v3402_v6 = vpop.eup %2489 }
 0x18b   : > { %1653 = vmatpush.msrb.mxu0 %v451_v9  ;;  %2413 = vmatpush.msra.mxu1 %v451_v9  ;;  %4108 = vst [vmem:[#allocation20_spill] sm:$0xff] %v3402_v6 }
 0x18c   : > { %1848 = vst.msk [vmem:[#allocation2 + $0xa8] sm:$0xff] %vm293_vm2, %v3368_v49  ;;  %2414 = vmatpush.msrb.mxu3 %v451_v9  ;;  %v885_v9 = vsub.f32 %v3169_v60, %v3189_v15  ;;  %v446_v60 = vld [vmem:[%s3339_s26 + $0x38] sm:$0xff] }
 0x18d   : > { %1835 = vst.msk [vmem:[#allocation2 + $0x40] sm:$0xff] %vm293_vm2, %v3372_v2  ;;  %1654 = vmatpush.msrb.mxu0 %v450_v3  ;;  %2415 = vmatpush.msra.mxu1 %v450_v3 }
 0x18e   : > { %999 = vperm.xlu2 %2466, %v3189_v15   ;;  %2416 = vmatpush.msrb.mxu3 %v450_v3  ;;  %v921_v15 = vmul.f32 1.442695, %v885_v9  ;;  %v898_v3 = vsub.f32 %v3203_v20, %v3220_v37  ;;  %v3441_v9 = vpop.eup %2491 }
 0x18f   : > { %1475 = vperm.xlu1 %2467, %v3386_v34   ;;  %1655 = vmatpush.msrb.mxu0 %v449_v44  ;;  %4109 = vst [vmem:[#allocation21_spill] sm:$0xff] %v3441_v9 }
 0x190   : > { %2417 = vmatpush.msra.mxu1 %v449_v44  ;;  %2418 = vmatpush.msrb.mxu3 %v449_v44  ;;  %v445_v44 = vld [vmem:[%s3339_s26 + $0x30] sm:$0xff]  ;;  %2493 = vpow2.f32 %v921_v15  ;;  %v442_v15 = vld [vmem:[%s3339_s26 + $0x18] sm:$0xff] }
 0x191   : > { %v830_v22 = vpop.xlane.xlu1 %829  ;;  %v804_v34 = vpop.xlane.xlu0 %803  ;;  %1656 = vmatpush.msrb.mxu0 %v448_v61 }
 0x192   : > { %v3407_v28 = vmax.f32 %v3393_v30, %v830_v22  ;;  %1540 = vperm.xlu0 %2468, %v3402_v6   ;;  %v3411_v48 = vmax.f32 %v3395_v52, %v804_v34  ;;  %v447_v34 = vld [vmem:[%s3339_s26 + $0x40] sm:$0xff]  ;;  %2419 = vmatpush.msra.mxu1 %v448_v61  ;;  %v3434_v22 = vld [vmem:[#allocation2 + $0x50] sm:$0xff] }
 0x193   : > { %1657 = vmatpush.msrb.mxu0 %v447_v34  ;;  %2420 = vmatpush.msrb.mxu3 %v448_v61  ;;  %v947_v61 = vmul.f32 1.442695, %v898_v3  ;;  %v3465_v3 = vld [vmem:[#allocation2 + $0xc0] sm:$0xff] }
 0x194   : > { %1849 = vst.msk [vmem:[#allocation2 + $0xb0] sm:$0xff] %vm293_vm2, %v3407_v28  ;;  %2421 = vmatpush.msra.mxu1 %v447_v34 }
 0x195   : > { %1836 = vst.msk [vmem:[#allocation2 + $0x48] sm:$0xff] %vm293_vm2, %v3411_v48  ;;  %1658 = vmatpush.msrb.mxu0 %v446_v60  ;;  %2422 = vmatpush.msrb.mxu3 %v447_v34  ;;  %2495 = vpow2.f32 %v947_v61  ;;  %v886_v34 = vsub.f32 %v3242_v13, %v3262_v7 }
 0x196   : > { %1069 = vperm.xlu2 %2466, %v3247_v26   ;;  %2423 = vmatpush.msra.mxu1 %v446_v60 }
 0x197   : > { %1004 = vperm.xlu1 %2467, %v3262_v7   ;;  %1659 = vmatpush.msrb.mxu0 %v445_v44 }
 0x198   : > { %2425 = vmatpush.msra.mxu1 %v445_v44  ;;  %2424 = vmatpush.msrb.mxu3 %v446_v60  ;;  %v3472_v60 = vpop.eup %2493 }
 0x199   : > { %v832_v20 = vpop.xlane.xlu2 %831  ;;  %v806_v37 = vpop.xlane.xlu1 %805  ;;  %1660 = vmatpush.msrb.mxu0 %v444_v47  ;;  %4110 = vst [vmem:[#allocation22_spill] sm:$0xff] %v3472_v60 }
 0x19a   : > { %v3446_v6 = vmax.f32 %v3432_v18, %v832_v20  ;;  %1615 = vperm.xlu0 %2468, %v3441_v9   ;;  %v3450_v50 = vmax.f32 %v3434_v22, %v806_v37  ;;  %2427 = vmatpush.msra.mxu1 %v444_v47  ;;  %v3467_v20 = vld [vmem:[#allocation2 + $0x58] sm:$0xff]  ;;  %v899_v37 = vsub.f32 %v3230_v24, %v3247_v26  ;;  %v923_v24 = vmul.f32 1.442695, %v886_v34 }
 0x19b   : > { %1661 = vmatpush.msrb.mxu0 %v443_v54  ;;  %2426 = vmatpush.msrb.mxu3 %v445_v44  ;;  %v3483_v44 = vpop.eup %2495  ;;  %v887_v34 = vsub.f32 %v3274_v11, %v3291_v39 }
 0x19c   : > { %1850 = vst.msk [vmem:[#allocation2 + $0xb8] sm:$0xff] %vm293_vm2, %v3446_v6  ;;  %2429 = vmatpush.msra.mxu1 %v443_v54  ;;  %v949_v26 = vmul.f32 1.442695, %v899_v37  ;;  %2497 = vpow2.f32 %v923_v24 }
 0x19d   : > { %1837 = vst.msk [vmem:[#allocation2 + $0x50] sm:$0xff] %vm293_vm2, %v3450_v50  ;;  %1662 = vmatpush.msrb.mxu0 %v442_v15  ;;  %2428 = vmatpush.msrb.mxu3 %v444_v47  ;;  %v3493_v47 = vld [vmem:[#allocation2 + $0x60] sm:$0xff]  ;;  %v925_v40 = vmul.f32 1.442695, %v887_v34 }
 0x19e   : > { %1009 = vperm.xlu2 %2466, %v3291_v39   ;;  %2431 = vmatpush.msra.mxu1 %v442_v15  ;;  %4111 = vst [vmem:[#allocation23_spill] sm:$0xff] %v3483_v44  ;;  %2499 = vpow2.f32 %v949_v26  ;;  %v900_v26 = vsub.f32 %v3272_v43, %v3287_v46 }
 0x19f   : > { %1074 = vperm.xlu1 %2467, %v3287_v46   ;;  %1663 = vmatpush.msrb.mxu0 %v441_v45  ;;  %2501 = vpow2.f32 %v925_v40  ;;  %v888_v46 = vsub.f32 %v3311_v41, %v3328_v63  ;;  %v901_v40 = vsub.f32 %v3309_v32, %v3324_v35 }
 0x1a0   : > { %2433 = vmatpush.msra.mxu1 %v441_v45  ;;  %2430 = vmatpush.msrb.mxu3 %v443_v54 }
 0x1a1   : > { %v834_v61 = vpop.xlane.xlu0 %833  ;;  %v808_v9 = vpop.xlane.xlu2 %807 }
 0x1a2   : > { %v3475_v13 = vmax.f32 %v3465_v3, %v834_v61  ;;  %1480 = vperm.xlu0 %2468, %v3472_v60   ;;  %v3479_v7 = vmax.f32 %v3467_v20, %v808_v9  ;;  %v440_v61 = vld [vmem:[%s3339_s26 + $0x8] sm:$0xff]  ;;  %v439_v60 = vld [vmem:[%s3339_s26] sm:$0xff]  ;;  %2432 = vmatpush.msrb.mxu3 %v442_v15  ;;  %v3508_v11 = vpop.eup %2497  ;;  %v951_v15 = vmul.f32 1.442695, %v900_v26 }
 0x1a3   : > { %v3491_v9 = vld [vmem:[#allocation2 + $0xc8] sm:$0xff]  ;;  %1664 = vmatpush.msrb.mxu0 %v440_v61  ;;  %2435 = vmatpush.msra.mxu1 %v440_v61 }
 0x1a4   : > { %1851 = vst.msk [vmem:[#allocation2 + $0xc0] sm:$0xff] %vm293_vm2, %v3475_v13  ;;  %2434 = vmatpush.msrb.mxu3 %v441_v45  ;;  %v3512_v39 = vpop.eup %2499  ;;  %2503 = vpow2.f32 %v951_v15 }
 0x1a5   : > { %1838 = vst.msk [vmem:[#allocation2 + $0x58] sm:$0xff] %vm293_vm2, %v3479_v7  ;;  %1665 = vmatpush.msrb.mxu0 %v439_v60  ;;  %2437 = vmatpush.msra.mxu1 %v439_v60  ;;  %v3528_v34 = vpop.eup %2501 }
 0x1a6   : > { %1545 = vperm.xlu2 %2466, %v3483_v44   ;;  %2436 = vmatpush.msrb.mxu3 %v440_v61  ;;  %4112 = vst [vmem:[#allocation24_spill] sm:$0xff] %v3512_v39  ;;  %v953_v61 = vmul.f32 1.442695, %v901_v40 }
 0x1a7   : > { %1014 = vperm.xlu1 %2467, %v3328_v63  }
 0x1a8   : > { %2438 = vmatpush.msrb.mxu3 %v439_v60  ;;  %v927_v60 = vmul.f32 1.442695, %v888_v46 }
 0x1a9   : > { %v836_v37 = vpop.xlane.xlu1 %835  ;;  %v810_v54 = vpop.xlane.xlu0 %809 }
 0x1aa   : > { %v3498_v44 = vmax.f32 %v3491_v9, %v836_v37  ;;  %1079 = vperm.xlu0 %2468, %v3324_v35   ;;  %v3502_v24 = vmax.f32 %v3493_v47, %v810_v54  ;;  %v3516_v37 = vld [vmem:[#allocation2 + $0xd0] sm:$0xff]  ;;  %v3534_v54 = vld [vmem:[#allocation2 + $0xd8] sm:$0xff]  ;;  %v3536_v26 = vpop.eup %2503  ;;  %2505 = vpow2.f32 %v927_v60  ;;  %v889_v35 = vsub.f32 %v3358_v56, %v3372_v2 }
 0x1ac   : > { %1852 = vst.msk [vmem:[#allocation2 + $0xc8] sm:$0xff] %vm293_vm2, %v3498_v44 }
 0x1ad   : > { %1839 = vst.msk [vmem:[#allocation2 + $0x60] sm:$0xff] %vm293_vm2, %v3502_v24 }
 0x1ae   : > { %1485 = vperm.xlu2 %2466, %v3508_v11  }
 0x1af   : > { %1550 = vperm.xlu1 %2467, %v3512_v39  }
 0x1b0   : > { %v3551_v32 = vpop.eup %2505 }
 0x1b1   : > { %v838_v45 = vpop.xlane.xlu2 %837  ;;  %4113 = vst [vmem:[#allocation25_spill] sm:$0xff] %v3551_v32 }
 0x1b2   : > { %v3519_v43 = vmax.f32 %v3516_v37, %v838_v45  ;;  %1019 = vperm.xlu0 %2468, %v3372_v2   ;;  %v903_v2 = vsub.f32 %v3393_v30, %v3407_v28 }
 0x1b4   : > { %1853 = vst.msk [vmem:[#allocation2 + $0xd0] sm:$0xff] %vm293_vm2, %v3519_v43 }
 0x1b6   : > { %1084 = vperm.xlu2 %2466, %v3368_v49  }
 0x1b7   : > { %1490 = vperm.xlu1 %2467, %v3528_v34  }
 0x1b9   : > { %v980_v63 = vpop.permute.xlu2 %979  ;;  %v840_v41 = vpop.xlane.xlu0 %839 }
 0x1ba   : > { %v1137_v15 = vsub.f32 %v2877_v51, %v980_v63  ;;  %v3540_v45 = vmax.f32 %v3534_v54, %v840_v41  ;;  %1555 = vperm.xlu0 %2468, %v3536_v26   ;;  %v902_v51 = vsub.f32 %v3356_v58, %v3368_v49  ;;  %v890_v49 = vsub.f32 %v3395_v52, %v3411_v48 }
 0x1bc   : > { %v1169_v39 = vmul.f32 1.442695, %v1137_v15  ;;  %1854 = vst.msk [vmem:[#allocation2 + $0xd8] sm:$0xff] %vm293_vm2, %v3540_v45  ;;  %v931_v41 = vmul.f32 1.442695, %v890_v49 }
 0x1be   : > { %2507 = vpow2.f32 %v1169_v39  ;;  %1024 = vperm.xlu2 %2466, %v3411_v48   ;;  %v929_v39 = vmul.f32 1.442695, %v889_v35  ;;  %v957_v48 = vmul.f32 1.442695, %v903_v2 }
 0x1bf   : > { %2509 = vpow2.f32 %v953_v61  ;;  %1089 = vperm.xlu1 %2467, %v3407_v28   ;;  %v955_v61 = vmul.f32 1.442695, %v902_v51 }
 0x1c0   : > { %2511 = vpow2.f32 %v929_v39 }
 0x1c1   : > { %v3553_v46 = vpop.permute.xlu1 %1044  ;;  %v3555_v40 = vpop.permute.xlu2 %1465  ;;  %2513 = vpow2.f32 %v955_v61 }
 0x1c2   : > { %1495 = vperm.xlu0 %2468, %v3551_v32   ;;  %2515 = vpow2.f32 %v931_v41  ;;  %v905_v41 = vsub.f32 %v3465_v3, %v3475_v13 }
 0x1c4   : > { %v3558_v60 = vpop.eup %2507 }
 0x1c5   : > { %v3560_v63 = vpop.eup %2509  ;;  %1666 = vmatmul.f32.vlgmr.msrb.gmra.mxu0 %v3558_v60 }
 0x1c6   : > { %1560 = vperm.xlu2 %2466, %v3560_v63   ;;  %v3574_v35 = vpop.eup %2511 }
 0x1c7   : > { %1029 = vperm.xlu1 %2467, %v3450_v50   ;;  %v3577_v39 = vpop.eup %2513 }
 0x1c8   : > { %4114 = vst [vmem:[#allocation26_spill] sm:$0xff] %v3577_v39  ;;  %v3590_v30 = vpop.eup %2515 }
 0x1c9   : > { %v3567_v58 = vpop.permute.xlu1 %1119  ;;  %v3569_v56 = vpop.permute.xlu2 %1054  ;;  %4115 = vst [vmem:[#allocation27_spill] sm:$0xff] %v3590_v30 }
 0x1ca   : > { %1094 = vperm.xlu0 %2468, %v3446_v6  }
 0x1cc   : > { %v985_v15 = vpop.permute.xlu0 %984 }
 0x1cd   : > { %v1138_v51 = vsub.f32 %v2887_v55, %v985_v15  ;;  %v891_v55 = vsub.f32 %v3434_v22, %v3450_v50 }
 0x1ce   : > { %1500 = vperm.xlu2 %2466, %v3574_v35  }
 0x1cf   : > { %v1171_v52 = vmul.f32 1.442695, %v1138_v51  ;;  %1565 = vperm.xlu1 %2467, %v3577_v39   ;;  %v933_v2 = vmul.f32 1.442695, %v891_v55  ;;  %v961_v55 = vmul.f32 1.442695, %v905_v41 }
 0x1d1   : > { %2517 = vpow2.f32 %v1171_v52  ;;  %v3581_v61 = vpop.permute.xlu1 %1460  ;;  %v3583_v32 = vpop.permute.xlu2 %1129 }
 0x1d2   : > { %1034 = vperm.xlu0 %2468, %v3479_v7   ;;  %2519 = vpow2.f32 %v957_v48  ;;  %v4116_v48 = vsub.f32 %v3432_v18, %v3446_v6  ;;  %v893_v6 = vsub.f32 %v3493_v47, %v3502_v24 }
 0x1d3   : > { %2521 = vpow2.f32 %v933_v2 }
 0x1d4   : > { %v3588_v28 = vpop.permute.xlu0 %1049  ;;  %v959_v52 = vmul.f32 1.442695, %v4116_v48 }
 0x1d6   : > { %1099 = vperm.xlu2 %2466, %v3475_v13  }
 0x1d7   : > { %v3593_v49 = vpop.eup %2517  ;;  %1505 = vperm.xlu1 %2467, %v3590_v30  }
 0x1d8   : > { %1669 = vmatmul.f32.gmra.mxu0 %v3593_v49  ;;  %v3599_v15 = vpop.eup %2519 }
 0x1d9   : > { %v990_v51 = vpop.permute.xlu1 %989  ;;  %v995_v50 = vpop.permute.xlu2 %994 }
 0x1da   : > { %v1139_v22 = vsub.f32 %v2902_v62, %v990_v51  ;;  %1570 = vperm.xlu0 %2468, %v3599_v15   ;;  %v1140_v3 = vsub.f32 %v2917_v4, %v995_v50  ;;  %v892_v62 = vsub.f32 %v3467_v20, %v3479_v7  ;;  %v3615_v18 = vpop.eup %2521  ;;  %v906_v4 = vsub.f32 %v3491_v9, %v3498_v44 }
 0x1db   : > { %v937_v7 = vmul.f32 1.442695, %v893_v6 }
 0x1dc   : > { %v1173_v30 = vmul.f32 1.442695, %v1139_v22  ;;  %v3606_v39 = vpop.permute.xlu0 %1124  ;;  %v935_v41 = vmul.f32 1.442695, %v892_v62 }
 0x1de   : > { %2523 = vpow2.f32 %v1173_v30  ;;  %1039 = vperm.xlu2 %2466, %v3502_v24   ;;  %v1175_v30 = vmul.f32 1.442695, %v1140_v3  ;;  %v963_v24 = vmul.f32 1.442695, %v906_v4 }
 0x1df   : > { %2525 = vpow2.f32 %v959_v52  ;;  %1104 = vperm.xlu1 %2467, %v3498_v44   ;;  %v908_v44 = vsub.f32 %v3534_v54, %v3540_v45 }
 0x1e0   : > { %2527 = vpow2.f32 %v961_v55 }
 0x1e1   : > { %v3617_v13 = vpop.permute.xlu1 %1059  ;;  %v3619_v2 = vpop.permute.xlu2 %1530  ;;  %2529 = vpow2.f32 %v1175_v30  ;;  %v967_v52 = vmul.f32 1.442695, %v908_v44 }
 0x1e2   : > { %4117 = vst [vmem:[#allocation28_spill] sm:$0xff] %v3619_v2  ;;  %1510 = vperm.xlu0 %2468, %v3615_v18   ;;  %2531 = vpow2.f32 %v935_v41  ;;  %v4124_v41 = vsub.f32 %v3516_v37, %v3519_v43 }
 0x1e3   : > { %2533 = vpow2.f32 %v937_v7 }
 0x1e4   : > { %v3624_v20 = vpop.eup %2523  ;;  %v3626_v51 = vpop.permute.xlu0 %1525  ;;  %2535 = vpow2.f32 %v963_v24  ;;  %v965_v7 = vmul.f32 1.442695, %v4124_v41 }
 0x1e5   : > { %4118 = vst [vmem:[#allocation29_spill] sm:$0xff] %v3626_v51  ;;  %v3628_v50 = vpop.eup %2525  ;;  %1672 = vmatmul.f32.vlgmr.msra.gmra.mxu1 %v3624_v20  ;;  %2537 = vpow2.f32 %v967_v52 }
 0x1e6   : > { %v3631_v47 = vpop.eup %2527  ;;  %1575 = vperm.xlu2 %2466, %v3628_v50  }
 0x1e7   : > { %1580 = vperm.xlu1 %2467, %v3631_v47   ;;  %v3642_v48 = vpop.eup %2529 }
 0x1e8   : > { %v3646_v3 = vpop.eup %2531 }
 0x1e9   : > { %v3637_v9 = vpop.permute.xlu1 %1134  ;;  %v3639_v22 = vpop.permute.xlu2 %1605 }
 0x1ea   : > { %4119 = vst [vmem:[#allocation30_spill] sm:$0xff] %v3639_v22  ;;  %1109 = vperm.xlu0 %2468, %v3519_v43   ;;  %v3649_v62 = vpop.eup %2533 }
 0x1eb   : > { %4121 = vst [vmem:[#allocation32_spill] sm:$0xff] %v3649_v62  ;;  %v3653_v54 = vpop.eup %2535 }
 0x1ec   : > { %v3644_v55 = vpop.permute.xlu0 %1600  ;;  %4122 = vst [vmem:[#allocation33_spill] sm:$0xff] %v3653_v54  ;;  %v3664_v22 = vpop.eup %2537 }
 0x1ed   : > { %4120 = vst [vmem:[#allocation31_spill] sm:$0xff] %v3644_v55  ;;  %1675 = vmatmul.f32.gmra.mxu1 %v3642_v48 }
 0x1ee   : > { %1515 = vperm.xlu2 %2466, %v3646_v3   ;;  %4125 = vst [vmem:[#allocation35_spill] sm:$0xff] %v3664_v22 }
 0x1ef   : > { %1520 = vperm.xlu1 %2467, %v3649_v62  }
 0x1f1   : > { %v3655_v6 = vpop.permute.xlu1 %1535  ;;  %v1000_v30 = vpop.permute.xlu2 %999 }
 0x1f2   : > { %4123 = vst [vmem:[#allocation34_spill] sm:$0xff] %v3655_v6  ;;  %v1141_v4 = vsub.f32 %v2927_v8, %v1000_v30  ;;  %1585 = vperm.xlu0 %2468, %v3653_v54   ;;  %v1151_v54 = vsub.f32 %v2896_v59, %v3588_v28 }
 0x1f4   : > { %v1177_v24 = vmul.f32 1.442695, %v1141_v4  ;;  %v3662_v44 = vpop.permute.xlu0 %1470 }
 0x1f6   : > { %2539 = vpow2.f32 %v1177_v24  ;;  %1114 = vperm.xlu2 %2466, %v3540_v45  }
 0x1f7   : > { %2541 = vpow2.f32 %v965_v7  ;;  %1595 = vperm.xlu1 %2467, %v3664_v22  }
 0x1f9   : > { %v3668_v52 = vpop.permute.xlu1 %1610  ;;  %v3670_v8 = vpop.permute.xlu2 %1069 }
 0x1fa   : > { %4126 = vst [vmem:[#allocation36_spill] sm:$0xff] %v3668_v52 }
 0x1fc   : > { %v3672_v30 = vpop.eup %2539  ;;  %v3674_v55 = vpop.permute.xlu0 %1064 }
 0x1fd   : > { %v3676_v37 = vpop.eup %2541  ;;  %1678 = vmatmul.f32.gmra.mxu1 %v3672_v30 }
 0x1fe   : > { %4127 = vst [vmem:[#allocation37_spill] sm:$0xff] %v3676_v37  ;;  %1590 = vperm.xlu2 %2466, %v3676_v37  }
 0x201   : > { %v3680_v43 = vpop.permute.xlu1 %1475  ;;  %v1010_v45 = vpop.permute.xlu2 %1009 }
 0x202   : > { %v1143_v22 = vsub.f32 %v2957_v19, %v1010_v45 }
 0x204   : > { %v3682_v4 = vpop.permute.xlu0 %1540  ;;  %v1181_v51 = vmul.f32 1.442695, %v1143_v22 }
 0x205   : > { %4128 = vst [vmem:[#allocation38_spill] sm:$0xff] %v3682_v4 }
 0x209   : > { %v1005_v41 = vpop.permute.xlu1 %1004  ;;  %v3684_v7 = vpop.permute.xlu2 %1545 }
 0x20a   : > { %4129 = vst [vmem:[#allocation39_spill] sm:$0xff] %v3684_v7  ;;  %v1142_v24 = vsub.f32 %v2950_v17, %v1005_v41  ;;  %v1150_v17 = vsub.f32 %v2882_v53, %v3553_v46  ;;  %v1197_v41 = vmul.f32 1.442695, %v1151_v54  ;;  %v1165_v46 = vsub.f32 %v2892_v57, %v3567_v58 }
 0x20c   : > { %v1179_v52 = vmul.f32 1.442695, %v1142_v24  ;;  %v3687_v6 = vpop.permute.xlu0 %1615  ;;  %v1195_v19 = vmul.f32 1.442695, %v1150_v17  ;;  %v1166_v24 = vsub.f32 %v2906_v0, %v3606_v39 }
 0x20d   : > { %4130 = vst [vmem:[#allocation40_spill] sm:$0xff] %v3687_v6 }
 0x20e   : > { %2543 = vpow2.f32 %v1179_v52 }
 0x20f   : > { %2545 = vpow2.f32 %v1181_v51  ;;  %v1227_v51 = vmul.f32 1.442695, %v1166_v24 }
 0x210   : > { %2547 = vpow2.f32 %v1197_v41 }
 0x211   : > { %v3690_v2 = vpop.permute.xlu1 %1074  ;;  %v3692_v62 = vpop.permute.xlu2 %1485  ;;  %2549 = vpow2.f32 %v1195_v19  ;;  %v1167_v19 = vsub.f32 %v2921_v5, %v3583_v32  ;;  %v1168_v5 = vsub.f32 %v2942_v14, %v3637_v9 }
 0x213   : > { %v1229_v24 = vmul.f32 1.442695, %v1167_v19 }
 0x214   : > { %v3696_v4 = vpop.eup %2543  ;;  %v3698_v37 = vpop.permute.xlu0 %1480 }
 0x215   : > { %1681 = vmatmul.f32.gmra.mxu1 %v3696_v4  ;;  %v3707_v22 = vpop.eup %2545 }
 0x216   : > { %v3715_v0 = vpop.eup %2547 }
 0x217   : > { %v3722_v54 = vpop.eup %2549 }
 0x219   : > { %v1015_v52 = vpop.permute.xlu1 %1014  ;;  %v1085_v45 = vpop.permute.xlu2 %1084 }
 0x21a   : > { %v1144_v59 = vsub.f32 %v2967_v23, %v1015_v52  ;;  %v1158_v28 = vsub.f32 %v2981_v29, %v1085_v45  ;;  %v1152_v23 = vsub.f32 %v2910_v1, %v3569_v56  ;;  %v1225_v29 = vmul.f32 1.442695, %v1165_v46 }
 0x21b   : > { %v1153_v1 = vsub.f32 %v2932_v10, %v3617_v13  ;;  %v1154_v13 = vsub.f32 %v2937_v12, %v3674_v55  ;;  %v1231_v12 = vmul.f32 1.442695, %v1168_v5  ;;  %v1426_v5 = vld [vmem:[#allocation4] sm:$0xff] }
 0x21c   : > { %v1183_v6 = vmul.f32 1.442695, %v1144_v59  ;;  %v1211_v7 = vmul.f32 1.442695, %v1158_v28  ;;  %1297 = vadd.xlane.f32.xlu0 %v3558_v60  ;;  %v3710_v53 = vpop.permute.xlu0 %1079  ;;  %v1199_v58 = vmul.f32 1.442695, %v1152_v23 }
 0x21d   : > { %1684 = vmatmul.f32.gmra.mxu1 %v3707_v22  ;;  %v1201_v52 = vmul.f32 1.442695, %v1153_v1  ;;  %v1203_v28 = vmul.f32 1.442695, %v1154_v13 }
 0x21e   : > { %2551 = vpow2.f32 %v1183_v6 }
 0x21f   : > { %2553 = vpow2.f32 %v1211_v7 }
 0x220   : > { %2555 = vpow2.f32 %v1227_v51 }
 0x221   : > { %v3719_v39 = vpop.permute.xlu1 %1550  ;;  %v1025_v60 = vpop.permute.xlu2 %1024  ;;  %1325 = vadd.xlane.f32.xlu1 %v3715_v0  ;;  %2557 = vpow2.f32 %v1225_v29 }
 0x222   : > { %2559 = vpow2.f32 %v1199_v58  ;;  %v1146_v45 = vsub.f32 %v2987_v31, %v1025_v60 }
 0x224   : > { %v3724_v57 = vpop.eup %2551  ;;  %1323 = vadd.xlane.f32.xlu0 %v3722_v54  ;;  %v1020_v6 = vpop.permute.xlu0 %1019  ;;  %v1187_v31 = vmul.f32 1.442695, %v1146_v45 }
 0x225   : > { %v3727_v7 = vpop.eup %2553  ;;  %v1145_v56 = vsub.f32 %v2977_v27, %v1020_v6  ;;  %1687 = vmatmul.f32.gmra.mxu1 %v3724_v57 }
 0x226   : > { %1729 = vmatmul.f32.vlgmr.msrb.gmra.mxu3 %v3727_v7  ;;  %v3735_v41 = vpop.eup %2555 }
 0x227   : > { %v1185_v17 = vmul.f32 1.442695, %v1145_v56  ;;  %1299 = vadd.xlane.f32.xlu2 %v3593_v49  ;;  %v3747_v49 = vpop.eup %2557  ;;  %v1157_v56 = vsub.f32 %v2971_v25, %v3710_v53 }
 0x228   : > { %v3754_v32 = vpop.eup %2559 }
 0x229   : > { %2561 = vpow2.f32 %v1185_v17  ;;  %v3740_v10 = vpop.permute.xlu1 %1490  ;;  %v3742_v27 = vpop.permute.xlu2 %1560  ;;  %1355 = vadd.xlane.f32.xlu1 %v3735_v41  ;;  %v1209_v25 = vmul.f32 1.442695, %v1157_v56 }
 0x22a   : > { %2563 = vpow2.f32 %v1201_v52 }
 0x22b   : > { %2565 = vpow2.f32 %v1229_v24 }
 0x22c   : > { %1353 = vadd.xlane.f32.xlu0 %v3747_v49  ;;  %v3750_v59 = vpop.permute.xlu0 %1555  ;;  %2567 = vpow2.f32 %v1187_v31  ;;  %v1618_v31 = vmul.f32 %v3581_v61, %v1426_v5  ;;  %v1427_v5 = vld [vmem:[#allocation4 + $0x8] sm:$0xff] }
 0x22d   : > { %2569 = vpow2.f32 %v1203_v28 }
 0x22e   : > { %2571 = vpow2.f32 %v1231_v12 }
 0x22f   : > { %v3756_v46 = vpop.eup %2561  ;;  %1327 = vadd.xlane.f32.xlu2 %v3754_v32 }
 0x230   : > { %1690 = vmatmul.f32.gmra.mxu1 %v3756_v46  ;;  %v3764_v9 = vpop.eup %2563 }
 0x231   : > { %v1090_v55 = vpop.permute.xlu1 %1089  ;;  %v3760_v51 = vpop.permute.xlu2 %1500  ;;  %1301 = vadd.xlane.f32.xlu1 %v3624_v20 }
 0x232   : > { %v1159_v14 = vsub.f32 %v2991_v33, %v1090_v55  ;;  %v3769_v60 = vpop.eup %2565  ;;  %v1155_v33 = vsub.f32 %v2946_v16, %v3670_v8  ;;  %v1156_v8 = vsub.f32 %v2961_v21, %v3690_v2 }
 0x233   : > { %v3771_v58 = vpop.eup %2567 }
 0x234   : > { %v1213_v23 = vmul.f32 1.442695, %v1159_v14  ;;  %1329 = vadd.xlane.f32.xlu0 %v3764_v9  ;;  %v3767_v29 = vpop.permute.xlu0 %1495  ;;  %v3774_v6 = vpop.eup %2569  ;;  %v1205_v45 = vmul.f32 1.442695, %v1155_v33  ;;  %v1207_v28 = vmul.f32 1.442695, %v1156_v8 }
 0x235   : > { %v3783_v19 = vpop.eup %2571 }
 0x236   : > { %2573 = vpow2.f32 %v1213_v23 }
 0x237   : > { %1357 = vadd.xlane.f32.xlu2 %v3769_v60 }
 0x238   : > { %1693 = vmatmul.f32.gmra.mxu1 %v3771_v58 }
 0x239   : > { %v1030_v20 = vpop.permute.xlu1 %1029  ;;  %v1100_v1 = vpop.permute.xlu2 %1099  ;;  %1331 = vadd.xlane.f32.xlu1 %v3774_v6 }
 0x23a   : > { %v1147_v17 = vsub.f32 %v2998_v36, %v1030_v20  ;;  %v1161_v53 = vsub.f32 %v3022_v42, %v1100_v1  ;;  %v4131_v42 = vld [vmem:[#allocation5_spill] sm:$0xff]  ;;  %v4132_v1 = vld [vmem:[#allocation6_spill] sm:$0xff] }
 0x23c   : > { %v3785_v52 = vpop.eup %2573  ;;  %v1189_v13 = vmul.f32 1.442695, %v1147_v17  ;;  %1359 = vadd.xlane.f32.xlu0 %v3783_v19  ;;  %v1095_v16 = vpop.permute.xlu0 %1094  ;;  %v1217_v14 = vmul.f32 1.442695, %v1161_v53 }
 0x23d   : > { %v1160_v24 = vsub.f32 %v3004_v38, %v1095_v16  ;;  %1732 = vmatmul.f32.gmra.mxu3 %v3785_v52 }
 0x23e   : > { %2575 = vpow2.f32 %v1189_v13 }
 0x23f   : > { %v1215_v36 = vmul.f32 1.442695, %v1160_v24  ;;  %1303 = vadd.xlane.f32.xlu2 %v3642_v48  ;;  %2577 = vpow2.f32 %v1205_v45 }
 0x241   : > { %2579 = vpow2.f32 %v1215_v36  ;;  %v3795_v12 = vpop.permute.xlu1 %1565  ;;  %v1040_v21 = vpop.permute.xlu2 %1039  ;;  %1307 = vadd.xlane.f32.xlu1 %v3696_v4  ;;  %v4133_v36 = vld [vmem:[#allocation7_spill] sm:$0xff] }
 0x242   : > { %2581 = vpow2.f32 %v1209_v25  ;;  %v1667_v38 = vpop.f32.mrf.mxu0 }
 0x243   : > { %v1763_v2 = vadd.f32 %v1667_v38, %v1618_v31  ;;  %2583 = vpow2.f32 %v1207_v28  ;;  %v1619_v31 = vmul.f32 %v3555_v40, %v1427_v5  ;;  %v1429_v5 = vld [vmem:[#allocation4 + $0x18] sm:$0xff] }
 0x244   : > { %v3798_v55 = vpop.eup %2575  ;;  %1305 = vadd.xlane.f32.xlu0 %v3672_v30  ;;  %v1035_v48 = vpop.permute.xlu0 %1034  ;;  %2585 = vpow2.f32 %v1217_v14  ;;  %v1149_v30 = vsub.f32 %v4132_v1, %v1040_v21  ;;  %v4135_v1 = vld [vmem:[#allocation9_spill] sm:$0xff] }
 0x245   : > { %1795 = vst.msk [vmem:[#allocation4] sm:$0xff] %vm358_vm0, %v1763_v2  ;;  %v1148_v61 = vsub.f32 %v4131_v42, %v1035_v48  ;;  %1696 = vmatmul.f32.gmra.mxu1 %v3798_v55  ;;  %v3804_v23 = vpop.eup %2577  ;;  %v4134_v48 = vld [vmem:[#allocation8_spill] sm:$0xff] }
 0x246   : > { %v1193_v16 = vmul.f32 1.442695, %v1149_v30 }
 0x247   : > { %v2580_v33 = vpop.eup %2579  ;;  %v1191_v4 = vmul.f32 1.442695, %v1148_v61  ;;  %1333 = vadd.xlane.f32.xlu2 %v3804_v23 }
 0x248   : > { %v3807_v20 = vpop.eup %2581  ;;  %1735 = vmatmul.f32.gmra.mxu3 %v2580_v33 }
 0x249   : > { %2587 = vpow2.f32 %v1191_v4  ;;  %v3810_v56 = vpop.permute.xlu1 %1505  ;;  %1337 = vadd.xlane.f32.xlu1 %v3807_v20  ;;  %v3813_v17 = vpop.permute.xlu2 %1575 }
 0x24a   : > { %v3815_v45 = vpop.eup %2583  ;;  %2589 = vpow2.f32 %v1193_v16 }
 0x24b   : > { %v2586_v8 = vpop.eup %2585 }
 0x24c   : > { %1335 = vadd.xlane.f32.xlu0 %v3815_v45  ;;  %v3818_v13 = vpop.permute.xlu0 %1570 }
 0x24f   : > { %v2588_v24 = vpop.eup %2587  ;;  %1309 = vadd.xlane.f32.xlu2 %v3707_v22 }
 0x250   : > { %1699 = vmatmul.f32.gmra.mxu1 %v2588_v24  ;;  %1738 = vmatmul.f32.gmra.mxu3 %v2586_v8  ;;  %v2590_v14 = vpop.eup %2589 }
 0x251   : > { %v1105_v25 = vpop.permute.xlu1 %1104  ;;  %1313 = vadd.xlane.f32.xlu1 %v3756_v46  ;;  %v3824_v21 = vpop.permute.xlu2 %1515 }
 0x252   : > { %v1162_v53 = vsub.f32 %v4133_v36, %v1105_v25 }
 0x254   : > { %v1219_v28 = vmul.f32 1.442695, %v1162_v53  ;;  %1311 = vadd.xlane.f32.xlu0 %v3724_v57  ;;  %v3827_v38 = vpop.permute.xlu0 %1510  ;;  %v1428_v57 = vld [vmem:[#allocation4 + $0x10] sm:$0xff] }
 0x255   : > { %v1670_v2 = vpop.f32.mrf.mxu0 }
 0x256   : > { %2591 = vpow2.f32 %v1219_v28  ;;  %v1764_v22 = vadd.f32 %v1670_v2, %v1619_v31  ;;  %v4136_v31 = vld [vmem:[#allocation11_spill] sm:$0xff] }
 0x257   : > { %1339 = vadd.xlane.f32.xlu2 %v3727_v7  ;;  %v1620_v7 = vmul.f32 %v3662_v44, %v1428_v57 }
 0x258   : > { %1796 = vst.msk [vmem:[#allocation4 + $0x8] sm:$0xff] %vm358_vm0, %v1764_v22  ;;  %1702 = vmatmul.f32.gmra.mxu1 %v2590_v14 }
 0x259   : > { %1343 = vadd.xlane.f32.xlu1 %v2580_v33  ;;  %v1115_v61 = vpop.permute.xlu2 %1114 }
 0x25a   : > { %v1164_v30 = vsub.f32 %v4135_v1, %v1115_v61  ;;  %v1432_v61 = vld [vmem:[#allocation4 + $0x30] sm:$0xff]  ;;  %v1262_v1 = vld [vmem:[#allocation3 + $0xe8] sm:$0xff] }
 0x25c   : > { %v2592_v46 = vpop.eup %2591  ;;  %1341 = vadd.xlane.f32.xlu0 %v3785_v52  ;;  %v1110_v40 = vpop.permute.xlu0 %1109  ;;  %v1223_v52 = vmul.f32 1.442695, %v1164_v30  ;;  %v1624_v30 = vmul.f32 %v3740_v10, %v1432_v61  ;;  %v4141_v10 = vld [vmem:[#allocation13_spill] sm:$0xff] }
 0x25d   : > { %v1163_v42 = vsub.f32 %v4134_v48, %v1110_v40  ;;  %1741 = vmatmul.f32.gmra.mxu3 %v2592_v46  ;;  %v1246_v48 = vld [vmem:[#allocation3 + $0x68] sm:$0xff] }
 0x25f   : > { %v1221_v4 = vmul.f32 1.442695, %v1163_v42  ;;  %1315 = vadd.xlane.f32.xlu2 %v3771_v58 }
 0x260   : > { %1705 = vmatmul.f32.gmra.mxu1 %v3722_v54  ;;  %v1621_v54 = vmul.f32 %v3680_v43, %v1429_v5 }
 0x261   : > { %2593 = vpow2.f32 %v1221_v4  ;;  %1319 = vadd.xlane.f32.xlu1 %v2588_v24 }
 0x262   : > { %v1673_v33 = vpop.f32.mrf.mxu1  ;;  %2595 = vpow2.f32 %v1223_v52 }
 0x263   : > { %v1765_v16 = vadd.f32 %v1673_v33, %v1620_v7  ;;  %v4139_v33 = vld [vmem:[#allocation10_spill] sm:$0xff] }
 0x264   : > { %1317 = vadd.xlane.f32.xlu0 %v3798_v55  ;;  %v1430_v55 = vld [vmem:[#allocation4 + $0x20] sm:$0xff]  ;;  %v3853_v53 = vpop.permute.xlu0 %1585 }
 0x265   : > { %1797 = vst.msk [vmem:[#allocation4 + $0x10] sm:$0xff] %vm358_vm0, %v1765_v16  ;;  %v1622_v43 = vmul.f32 %v3698_v37, %v1430_v55  ;;  %v1431_v37 = vld [vmem:[#allocation4 + $0x28] sm:$0xff]  ;;  %v1261_v55 = vld [vmem:[#allocation3 + $0xe0] sm:$0xff] }
 0x267   : > { %v2594_v25 = vpop.eup %2593  ;;  %1345 = vadd.xlane.f32.xlu2 %v2586_v8  ;;  %v3843_v8 = vpop.permute.xlu1 %1580 }
 0x268   : > { %1708 = vmatmul.f32.gmra.mxu1 %v3715_v0  ;;  %1744 = vmatmul.f32.gmra.mxu3 %v2594_v25  ;;  %v2596_v24 = vpop.eup %2595 }
 0x269   : > { %1349 = vadd.xlane.f32.xlu1 %v2594_v25 }
 0x26a   : > { %v1676_v44 = vpop.f32.mrf.mxu1 }
 0x26b   : > { %v1766_v58 = vadd.f32 %v1676_v44, %v1621_v54 }
 0x26c   : > { %1347 = vadd.xlane.f32.xlu0 %v2592_v46  ;;  %v4137_v46 = vld [vmem:[#allocation14_spill] sm:$0xff] }
 0x26d   : > { %1798 = vst.msk [vmem:[#allocation4 + $0x18] sm:$0xff] %vm358_vm0, %v1766_v58  ;;  %v4140_v58 = vld [vmem:[#allocation17_spill] sm:$0xff] }
 0x26f   : > { %1321 = vadd.xlane.f32.xlu2 %v2590_v14  ;;  %v3863_v14 = vpop.permute.xlu2 %1590 }
 0x270   : > { %1711 = vmatmul.f32.gmra.mxu1 %v3754_v32  ;;  %1747 = vmatmul.f32.gmra.mxu3 %v2596_v24  ;;  %v3851_v32 = vpop.permute.xlu1 %1520 }
 0x277   : > { %1351 = vadd.xlane.f32.xlu2 %v2596_v24  ;;  %v1294_v24 = vmul.f32 %v4140_v58, %v1262_v1  ;;  %v4145_v58 = vld [vmem:[#allocation18_spill] sm:$0xff] }
 0x278   : > { %1714 = vmatmul.f32.gmra.mxu1 %v3764_v9  ;;  %1750 = vmatmul.f32.gmra.mxu3 %v3747_v49  ;;  %v1233_v9 = vld [vmem:[#allocation3] sm:$0xff]  ;;  %v3857_v49 = vpop.permute.xlu1 %1595 }
 0x279   : > { %v1265_v28 = vmul.f32 %v4136_v31, %v1233_v9  ;;  %v1248_v9 = vld [vmem:[#allocation3 + $0x78] sm:$0xff] }
 0x27a   : > { %v1679_v0 = vpop.f32.mrf.mxu1 }
 0x27b   : > { %v1767_v36 = vadd.f32 %v1679_v0, %v1622_v43  ;;  %v1433_v0 = vld [vmem:[#allocation4 + $0x38] sm:$0xff] }
 0x27d   : > { %1799 = vst.msk [vmem:[#allocation4 + $0x20] sm:$0xff] %vm358_vm0, %v1767_v36  ;;  %v1293_v36 = vmul.f32 %v4141_v10, %v1261_v55  ;;  %v4146_v10 = vld [vmem:[#allocation23_spill] sm:$0xff] }
 0x280   : > { %1717 = vmatmul.f32.gmra.mxu1 %v3774_v6  ;;  %1753 = vmatmul.f32.gmra.mxu3 %v3735_v41  ;;  %v1247_v41 = vld [vmem:[#allocation3 + $0x70] sm:$0xff]  ;;  %v1623_v6 = vmul.f32 %v3692_v62, %v1431_v37 }
 0x281   : > { %v1279_v40 = vmul.f32 %v4137_v46, %v1247_v41  ;;  %v1625_v41 = vmul.f32 %v3767_v29, %v1433_v0 }
 0x288   : > { %1720 = vmatmul.f32.gmra.mxu1 %v3804_v23  ;;  %1756 = vmatmul.f32.gmra.mxu3 %v3769_v60 }
 0x28f   : > { %v1298_v2 = vpop.xlane.xlu0 %1297 }
 0x290   : > { %v1361_v22 = vadd.f32 %v1298_v2, %v1265_v28  ;;  %1723 = vmatmul.f32.gmra.mxu1 %v3815_v45  ;;  %1759 = vmatmul.f32.gmra.mxu3 %v3783_v19  ;;  %v4138_v45 = vld [vmem:[#allocation12_spill] sm:$0xff]  ;;  %v1234_v19 = vld [vmem:[#allocation3 + $0x8] sm:$0xff] }
 0x291   : > { %v1278_v4 = vmul.f32 %v4138_v45, %v1246_v48  ;;  %v1266_v16 = vmul.f32 %v4139_v33, %v1234_v19  ;;  %v1249_v45 = vld [vmem:[#allocation3 + $0x80] sm:$0xff] }
 0x292   : > { %1394 = vst.msk [vmem:[#allocation3] sm:$0xff] %vm293_vm2, %v1361_v22  ;;  %v1682_v60 = vpop.f32.mrf.mxu1  ;;  %v1235_v22 = vld [vmem:[#allocation3 + $0x10] sm:$0xff] }
 0x293   : > { %v1768_v23 = vadd.f32 %v1682_v60, %v1623_v6  ;;  %v4142_v6 = vld [vmem:[#allocation15_spill] sm:$0xff] }
 0x294   : > { %v1326_v42 = vpop.xlane.xlu1 %1325  ;;  %v1280_v60 = vmul.f32 %v4142_v6, %v1248_v9  ;;  %v1264_v9 = vld [vmem:[#allocation3 + $0xf8] sm:$0xff] }
 0x295   : > { %1800 = vst.msk [vmem:[#allocation4 + $0x28] sm:$0xff] %vm358_vm0, %v1768_v23  ;;  %v1375_v57 = vadd.f32 %v1326_v42, %v1279_v40 }
 0x297   : > { %1408 = vst.msk [vmem:[#allocation3 + $0x70] sm:$0xff] %vm293_vm2, %v1375_v57  ;;  %v1324_v62 = vpop.xlane.xlu0 %1323  ;;  %v4143_v57 = vld [vmem:[#allocation16_spill] sm:$0xff] }
 0x298   : > { %v1374_v7 = vadd.f32 %v1324_v62, %v1278_v4  ;;  %1726 = vmatmul.f32.gmra.mxu1 %v3807_v20  ;;  %v1267_v61 = vmul.f32 %v4143_v57, %v1235_v22  ;;  %v1447_v62 = vld [vmem:[#allocation4 + $0xa8] sm:$0xff] }
 0x299   : > { %v1862_v52 = vld [vmem:[#allocation3] sm:$0xff]  ;;  %v1435_v57 = vld [vmem:[#allocation4 + $0x48] sm:$0xff] }
 0x29a   : > { %1407 = vst.msk [vmem:[#allocation3 + $0x68] sm:$0xff] %vm293_vm2, %v1374_v7  ;;  %v1685_v5 = vpop.f32.mrf.mxu1  ;;  %v1300_v25 = vpop.xlane.xlu2 %1299  ;;  %2597 = vrcp.f32 %v1862_v52  ;;  %v4144_v7 = vld [vmem:[#allocation20_spill] sm:$0xff]  ;;  %v1639_v52 = vmul.f32 %v3795_v12, %v1447_v62 }
 0x29b   : > { %v1769_v54 = vadd.f32 %v1685_v5, %v1624_v30  ;;  %v1362_v44 = vadd.f32 %v1300_v25, %v1266_v16  ;;  %v1281_v1 = vmul.f32 %v4144_v7, %v1249_v45  ;;  %v1263_v30 = vld [vmem:[#allocation3 + $0xf0] sm:$0xff]  ;;  %v1250_v25 = vld [vmem:[#allocation3 + $0x88] sm:$0xff] }
 0x29c   : > { %v1356_v43 = vpop.xlane.xlu1 %1355 }
 0x29d   : > { %1801 = vst.msk [vmem:[#allocation4 + $0x30] sm:$0xff] %vm358_vm0, %v1769_v54  ;;  %v1390_v20 = vadd.f32 %v1356_v43, %v1294_v24  ;;  %v1434_v54 = vld [vmem:[#allocation4 + $0x40] sm:$0xff]  ;;  %v1295_v24 = vmul.f32 %v4145_v58, %v1263_v30 }
 0x29e   : > { %1395 = vst.msk [vmem:[#allocation3 + $0x8] sm:$0xff] %vm293_vm2, %v1362_v44  ;;  %v1876_v37 = vld [vmem:[#allocation3 + $0x70] sm:$0xff] }
 0x29f   : > { %1423 = vst.msk [vmem:[#allocation3 + $0xe8] sm:$0xff] %vm293_vm2, %v1390_v20  ;;  %v1354_v31 = vpop.xlane.xlu0 %1353  ;;  %2599 = vrcp.f32 %v1876_v37  ;;  %v1626_v37 = vmul.f32 %v3760_v51, %v1434_v54 }
 0x2a0   : > { %v2598_v28 = vpop.eup %2597  ;;  %v1389_v2 = vadd.f32 %v1354_v31, %v1293_v36  ;;  %v1282_v36 = vmul.f32 %v4146_v10, %v1250_v25  ;;  %v4149_v25 = vld [vmem:[#allocation22_spill] sm:$0xff] }
 0x2a1   : > { %1960 = vperm.xlu2 %2466, %v2598_v28   ;;  %v1875_v23 = vld [vmem:[#allocation3 + $0x68] sm:$0xff] }
 0x2a2   : > { %1422 = vst.msk [vmem:[#allocation3 + $0xe0] sm:$0xff] %vm293_vm2, %v1389_v2  ;;  %v1688_v46 = vpop.f32.mrf.mxu1  ;;  %v1328_v40 = vpop.xlane.xlu2 %1327  ;;  %2601 = vrcp.f32 %v1875_v23 }
 0x2a3   : > { %v1770_v48 = vadd.f32 %v1688_v46, %v1625_v41  ;;  %v1376_v42 = vadd.f32 %v1328_v40, %v1280_v60  ;;  %v4147_v41 = vld [vmem:[#allocation21_spill] sm:$0xff]  ;;  %v1236_v60 = vld [vmem:[#allocation3 + $0x18] sm:$0xff] }
 0x2a4   : > { %v1302_v4 = vpop.xlane.xlu1 %1301  ;;  %v1296_v6 = vmul.f32 %v4147_v41, %v1264_v9  ;;  %v1436_v41 = vld [vmem:[#allocation4 + $0x50] sm:$0xff] }
 0x2a5   : > { %v2600_v19 = vpop.eup %2599  ;;  %1802 = vst.msk [vmem:[#allocation4 + $0x38] sm:$0xff] %vm358_vm0, %v1770_v48  ;;  %v1363_v29 = vadd.f32 %v1302_v4, %v1267_v61  ;;  %v1863_v40 = vld [vmem:[#allocation3 + $0x8] sm:$0xff]  ;;  %v4148_v61 = vld [vmem:[#allocation19_spill] sm:$0xff] }
 0x2a6   : > { %1409 = vst.msk [vmem:[#allocation3 + $0x78] sm:$0xff] %vm293_vm2, %v1376_v42  ;;  %2030 = vperm.xlu0 %2468, %v2600_v19   ;;  %v1238_v42 = vld [vmem:[#allocation3 + $0x28] sm:$0xff]  ;;  %v1268_v45 = vmul.f32 %v4148_v61, %v1236_v60  ;;  %v1239_v60 = vld [vmem:[#allocation3 + $0x30] sm:$0xff] }
 0x2a7   : > { %1396 = vst.msk [vmem:[#allocation3 + $0x10] sm:$0xff] %vm293_vm2, %v1363_v29  ;;  %v1330_v33 = vpop.xlane.xlu0 %1329  ;;  %v1270_v62 = vmul.f32 %v3508_v11, %v1238_v42  ;;  %v1237_v29 = vld [vmem:[#allocation3 + $0x20] sm:$0xff] }
 0x2a8   : > { %v2602_v16 = vpop.eup %2601  ;;  %v1377_v5 = vadd.f32 %v1330_v33, %v1281_v1  ;;  %v1627_v1 = vmul.f32 %v3810_v56, %v1435_v57  ;;  %v1269_v54 = vmul.f32 %v4149_v25, %v1237_v29  ;;  %v1241_v42 = vld [vmem:[#allocation3 + $0x40] sm:$0xff]  ;;  %v1628_v57 = vmul.f32 %v3827_v38, %v1436_v41 }
 0x2a9   : > { %v1730_v44 = vpop.f32.mrf.mxu3  ;;  %2025 = vperm.xlu1 %2467, %v2602_v16   ;;  %v1890_v55 = vld [vmem:[#allocation3 + $0xe0] sm:$0xff] }
 0x2aa   : > { %1410 = vst.msk [vmem:[#allocation3 + $0x80] sm:$0xff] %vm293_vm2, %v1377_v5  ;;  %v1784_v43 = vadd.f32 %v1730_v44, %v1639_v52  ;;  %v1358_v20 = vpop.xlane.xlu2 %1357  ;;  %2603 = vrcp.f32 %v1890_v55  ;;  %v1251_v44 = vld [vmem:[#allocation3 + $0x90] sm:$0xff] }
 0x2ab   : > { %v1391_v0 = vadd.f32 %v1358_v20, %v1295_v24  ;;  %v4150_v20 = vld [vmem:[#allocation24_spill] sm:$0xff] }
 0x2ac   : > { %1816 = vst.msk [vmem:[#allocation4 + $0xa8] sm:$0xff] %vm358_vm0, %v1784_v43  ;;  %v1332_v12 = vpop.xlane.xlu1 %1331  ;;  %v1253_v43 = vld [vmem:[#allocation3 + $0xa0] sm:$0xff] }
 0x2ad   : > { %1424 = vst.msk [vmem:[#allocation3 + $0xf0] sm:$0xff] %vm293_vm2, %v1391_v0  ;;  %v1378_v31 = vadd.f32 %v1332_v12, %v1282_v36  ;;  %v1691_v28 = vpop.f32.mrf.mxu1  ;;  %v1877_v2 = vld [vmem:[#allocation3 + $0x78] sm:$0xff]  ;;  %v1283_v0 = vmul.f32 %v4150_v20, %v1251_v44  ;;  %v1285_v9 = vmul.f32 %v3560_v63, %v1253_v43  ;;  %v1448_v12 = vld [vmem:[#allocation4 + $0xb0] sm:$0xff] }
 0x2ae   : > { %v1771_v22 = vadd.f32 %v1691_v28, %v1626_v37  ;;  %2605 = vrcp.f32 %v1877_v2  ;;  %v1864_v23 = vld [vmem:[#allocation3 + $0x10] sm:$0xff]  ;;  %v1252_v37 = vld [vmem:[#allocation3 + $0x98] sm:$0xff] }
 0x2af   : > { %1411 = vst.msk [vmem:[#allocation3 + $0x88] sm:$0xff] %vm293_vm2, %v1378_v31  ;;  %v1360_v46 = vpop.xlane.xlu0 %1359  ;;  %2607 = vrcp.f32 %v1864_v23 }
 0x2b0   : > { %v2604_v51 = vpop.eup %2603  ;;  %1803 = vst.msk [vmem:[#allocation4 + $0x40] sm:$0xff] %vm358_vm0, %v1771_v22  ;;  %v1392_v48 = vadd.f32 %v1360_v46, %v1296_v6  ;;  %2609 = vrcp.f32 %v1863_v40  ;;  %v1284_v6 = vmul.f32 %v3536_v26, %v1252_v37  ;;  %v1640_v46 = vmul.f32 %v3818_v13, %v1448_v12  ;;  %v1255_v12 = vld [vmem:[#allocation3 + $0xb0] sm:$0xff] }
 0x2b1   : > { %2100 = vperm.xlu1 %2467, %v2604_v51   ;;  %v1878_v24 = vld [vmem:[#allocation3 + $0x80] sm:$0xff] }
 0x2b2   : > { %1425 = vst.msk [vmem:[#allocation3 + $0xf8] sm:$0xff] %vm293_vm2, %v1392_v48  ;;  %v1304_v4 = vpop.xlane.xlu2 %1303 }
 0x2b3   : > { %v1364_v19 = vadd.f32 %v1304_v4, %v1268_v45  ;;  %v1271_v45 = vmul.f32 %v3528_v34, %v1239_v60 }
 0x2b4   : > { %v2606_v7 = vpop.eup %2605  ;;  %v1308_v30 = vpop.xlane.xlu1 %1307 }
 0x2b5   : > { %v2608_v33 = vpop.eup %2607  ;;  %1397 = vst.msk [vmem:[#allocation3 + $0x18] sm:$0xff] %vm293_vm2, %v1364_v19  ;;  %v1366_v16 = vadd.f32 %v1308_v30, %v1270_v62  ;;  %2035 = vperm.xlu2 %2466, %v2606_v7   ;;  %v1694_v52 = vpop.f32.mrf.mxu1  ;;  %v1273_v7 = vmul.f32 %v3574_v35, %v1241_v42  ;;  %v1438_v42 = vld [vmem:[#allocation4 + $0x60] sm:$0xff] }
 0x2b6   : > { %v1772_v5 = vadd.f32 %v1694_v52, %v1627_v1  ;;  %1970 = vperm.xlu0 %2468, %v2608_v33   ;;  %v1879_v58 = vld [vmem:[#allocation3 + $0x88] sm:$0xff]  ;;  %v2610_v55 = vpop.eup %2609  ;;  %v1240_v1 = vld [vmem:[#allocation3 + $0x38] sm:$0xff] }
 0x2b7   : > { %1399 = vst.msk [vmem:[#allocation3 + $0x28] sm:$0xff] %vm293_vm2, %v1366_v16  ;;  %v1306_v11 = vpop.xlane.xlu0 %1305  ;;  %2611 = vrcp.f32 %v1879_v58  ;;  %v4151_v16 = vld [vmem:[#allocation25_spill] sm:$0xff] }
 0x2b8   : > { %1804 = vst.msk [vmem:[#allocation4 + $0x48] sm:$0xff] %vm358_vm0, %v1772_v5  ;;  %v1365_v56 = vadd.f32 %v1306_v11, %v1269_v54  ;;  %2613 = vrcp.f32 %v1878_v24  ;;  %v1272_v52 = vmul.f32 %v4151_v16, %v1240_v1  ;;  %v1254_v5 = vld [vmem:[#allocation3 + $0xa8] sm:$0xff]  ;;  %v1449_v54 = vld [vmem:[#allocation4 + $0xb8] sm:$0xff] }
 0x2b9   : > { %1965 = vperm.xlu1 %2467, %v2610_v55   ;;  %v1256_v11 = vld [vmem:[#allocation3 + $0xb8] sm:$0xff]  ;;  %v4152_v55 = vld [vmem:[#allocation26_spill] sm:$0xff]  ;;  %v1641_v20 = vmul.f32 %v3813_v17, %v1449_v54 }
 0x2ba   : > { %1398 = vst.msk [vmem:[#allocation3 + $0x20] sm:$0xff] %vm293_vm2, %v1365_v56  ;;  %v1334_v10 = vpop.xlane.xlu2 %1333  ;;  %v1437_v24 = vld [vmem:[#allocation4 + $0x58] sm:$0xff]  ;;  %v1286_v56 = vmul.f32 %v4152_v55, %v1254_v5  ;;  %v1288_v37 = vmul.f32 %v3628_v50, %v1256_v11  ;;  %v1242_v50 = vld [vmem:[#allocation3 + $0x48] sm:$0xff] }
 0x2bb   : > { %v1379_v36 = vadd.f32 %v1334_v10, %v1283_v0 }
 0x2bc   : > { %v1338_v31 = vpop.xlane.xlu1 %1337  ;;  %v1865_v28 = vld [vmem:[#allocation3 + $0x18] sm:$0xff] }
 0x2bd   : > { %v2612_v2 = vpop.eup %2611  ;;  %1412 = vst.msk [vmem:[#allocation3 + $0x90] sm:$0xff] %vm293_vm2, %v1379_v36  ;;  %v1381_v22 = vadd.f32 %v1338_v31, %v1285_v9  ;;  %2615 = vrcp.f32 %v1865_v28  ;;  %v1629_v31 = vmul.f32 %v3824_v21, %v1437_v24 }
 0x2be   : > { %2045 = vperm.xlu0 %2468, %v2612_v2   ;;  %v1867_v23 = vld [vmem:[#allocation3 + $0x28] sm:$0xff]  ;;  %v2614_v40 = vpop.eup %2613 }
 0x2bf   : > { %1414 = vst.msk [vmem:[#allocation3 + $0xa0] sm:$0xff] %vm293_vm2, %v1381_v22  ;;  %v1336_v63 = vpop.xlane.xlu0 %1335  ;;  %2617 = vrcp.f32 %v1867_v23  ;;  %v1287_v23 = vmul.f32 %v3599_v15, %v1255_v12 }
 0x2c0   : > { %v1380_v51 = vadd.f32 %v1336_v63, %v1284_v6  ;;  %v1733_v48 = vpop.f32.mrf.mxu3  ;;  %v1450_v63 = vld [vmem:[#allocation4 + $0xc0] sm:$0xff] }
 0x2c1   : > { %v1785_v61 = vadd.f32 %v1733_v48, %v1640_v46  ;;  %2040 = vperm.xlu1 %2467, %v2614_v40   ;;  %v1866_v4 = vld [vmem:[#allocation3 + $0x20] sm:$0xff]  ;;  %v1244_v48 = vld [vmem:[#allocation3 + $0x58] sm:$0xff] }
 0x2c2   : > { %1413 = vst.msk [vmem:[#allocation3 + $0x98] sm:$0xff] %vm293_vm2, %v1380_v51  ;;  %v1310_v26 = vpop.xlane.xlu2 %1309  ;;  %v1697_v19 = vpop.f32.mrf.mxu1  ;;  %2619 = vrcp.f32 %v1866_v4  ;;  %v1642_v4 = vmul.f32 %v3843_v8, %v1450_v63  ;;  %v1440_v63 = vld [vmem:[#allocation4 + $0x70] sm:$0xff] }
 0x2c3   : > { %v2616_v13 = vpop.eup %2615  ;;  %1817 = vst.msk [vmem:[#allocation4 + $0xb0] sm:$0xff] %vm358_vm0, %v1785_v61  ;;  %v1367_v62 = vadd.f32 %v1310_v26, %v1271_v45  ;;  %v1773_v29 = vadd.f32 %v1697_v19, %v1628_v57  ;;  %v4153_v57 = vld [vmem:[#allocation27_spill] sm:$0xff] }
 0x2c4   : > { %v1314_v30 = vpop.xlane.xlu1 %1313  ;;  %1975 = vperm.xlu2 %2466, %v2616_v13   ;;  %v1880_v38 = vld [vmem:[#allocation3 + $0x90] sm:$0xff]  ;;  %v1274_v61 = vmul.f32 %v4153_v57, %v1242_v50 }
 0x2c5   : > { %v2618_v33 = vpop.eup %2617  ;;  %1400 = vst.msk [vmem:[#allocation3 + $0x30] sm:$0xff] %vm293_vm2, %v1367_v62  ;;  %v1369_v34 = vadd.f32 %v1314_v30, %v1273_v7  ;;  %2621 = vrcp.f32 %v1880_v38  ;;  %v1276_v62 = vmul.f32 %v3646_v3, %v1244_v48  ;;  %v1630_v7 = vmul.f32 %v3851_v32, %v1438_v42  ;;  %v1257_v3 = vld [vmem:[#allocation3 + $0xc0] sm:$0xff] }
 0x2c6   : > { %1805 = vst.msk [vmem:[#allocation4 + $0x50] sm:$0xff] %vm358_vm0, %v1773_v29  ;;  %1985 = vperm.xlu0 %2468, %v2618_v33   ;;  %v1882_v25 = vld [vmem:[#allocation3 + $0xa0] sm:$0xff]  ;;  %v1243_v29 = vld [vmem:[#allocation3 + $0x50] sm:$0xff] }
 0x2c7   : > { %1402 = vst.msk [vmem:[#allocation3 + $0x40] sm:$0xff] %vm293_vm2, %v1369_v34  ;;  %v1312_v35 = vpop.xlane.xlu0 %1311  ;;  %2623 = vrcp.f32 %v1882_v25 }
 0x2c8   : > { %v2620_v44 = vpop.eup %2619  ;;  %v1368_v58 = vadd.f32 %v1312_v35, %v1272_v52  ;;  %v1275_v52 = vmul.f32 %v3615_v18, %v1243_v29  ;;  %v1259_v35 = vld [vmem:[#allocation3 + $0xd0] sm:$0xff] }
 0x2c9   : > { %1980 = vperm.xlu1 %2467, %v2620_v44   ;;  %v1881_v43 = vld [vmem:[#allocation3 + $0x98] sm:$0xff]  ;;  %v1439_v44 = vld [vmem:[#allocation4 + $0x68] sm:$0xff]  ;;  %v1452_v29 = vld [vmem:[#allocation4 + $0xd0] sm:$0xff] }
 0x2ca   : > { %1401 = vst.msk [vmem:[#allocation3 + $0x38] sm:$0xff] %vm293_vm2, %v1368_v58  ;;  %v1340_v0 = vpop.xlane.xlu2 %1339  ;;  %2625 = vrcp.f32 %v1881_v43  ;;  %v1289_v58 = vmul.f32 %v3631_v47, %v1257_v3 }
 0x2cb   : > { %v2622_v10 = vpop.eup %2621  ;;  %v1382_v36 = vadd.f32 %v1340_v0, %v1286_v56  ;;  %v1736_v9 = vpop.f32.mrf.mxu3  ;;  %v4154_v56 = vld [vmem:[#allocation37_spill] sm:$0xff] }
 0x2cc   : > { %v1786_v28 = vadd.f32 %v1736_v9, %v1641_v20  ;;  %v1344_v2 = vpop.xlane.xlu1 %1343  ;;  %2050 = vperm.xlu2 %2466, %v2622_v10   ;;  %v1868_v22 = vld [vmem:[#allocation3 + $0x30] sm:$0xff]  ;;  %v1291_v43 = vmul.f32 %v4154_v56, %v1259_v35  ;;  %v1258_v20 = vld [vmem:[#allocation3 + $0xc8] sm:$0xff]  ;;  %v4155_v0 = vld [vmem:[#allocation29_spill] sm:$0xff] }
 0x2cd   : > { %v2624_v41 = vpop.eup %2623  ;;  %1415 = vst.msk [vmem:[#allocation3 + $0xa8] sm:$0xff] %vm293_vm2, %v1382_v36  ;;  %v1384_v17 = vadd.f32 %v1344_v2, %v1288_v37  ;;  %v1700_v6 = vpop.f32.mrf.mxu1  ;;  %2627 = vrcp.f32 %v1868_v22  ;;  %v1631_v10 = vmul.f32 %v4155_v0, %v1439_v44  ;;  %v1451_v36 = vld [vmem:[#allocation4 + $0xc8] sm:$0xff]  ;;  %v4156_v2 = vld [vmem:[#allocation33_spill] sm:$0xff] }
 0x2ce   : > { %1818 = vst.msk [vmem:[#allocation4 + $0xb8] sm:$0xff] %vm358_vm0, %v1786_v28  ;;  %v1774_v60 = vadd.f32 %v1700_v6, %v1629_v31  ;;  %2060 = vperm.xlu0 %2468, %v2624_v41   ;;  %v1870_v46 = vld [vmem:[#allocation3 + $0x40] sm:$0xff]  ;;  %v1290_v22 = vmul.f32 %v4156_v2, %v1258_v20  ;;  %v1643_v6 = vmul.f32 %v3853_v53, %v1451_v36  ;;  %v1891_v35 = vld [vmem:[#allocation3 + $0xe8] sm:$0xff]  ;;  %v4162_v2 = vld [vmem:[#allocation31_spill] sm:$0xff] }
 0x2cf   : > { %1417 = vst.msk [vmem:[#allocation3 + $0xb8] sm:$0xff] %vm293_vm2, %v1384_v17  ;;  %v1342_v21 = vpop.xlane.xlu0 %1341  ;;  %2629 = vrcp.f32 %v1870_v46  ;;  %v1245_v41 = vld [vmem:[#allocation3 + $0x60] sm:$0xff]  ;;  %v4161_v0 = vld [vmem:[#allocation38_spill] sm:$0xff] }
 0x2d0   : > { %v2626_v40 = vpop.eup %2625  ;;  %1806 = vst.msk [vmem:[#allocation4 + $0x58] sm:$0xff] %vm358_vm0, %v1774_v60  ;;  %v1383_v51 = vadd.f32 %v1342_v21, %v1287_v23 }
 0x2d1   : > { %2055 = vperm.xlu1 %2467, %v2626_v40   ;;  %v1869_v45 = vld [vmem:[#allocation3 + $0x38] sm:$0xff] }
 0x2d2   : > { %1416 = vst.msk [vmem:[#allocation3 + $0xb0] sm:$0xff] %vm293_vm2, %v1383_v51  ;;  %v1316_v15 = vpop.xlane.xlu2 %1315  ;;  %2631 = vrcp.f32 %v1869_v45  ;;  %v4157_v40 = vld [vmem:[#allocation32_spill] sm:$0xff] }
 0x2d3   : > { %v2628_v26 = vpop.eup %2627  ;;  %v1370_v19 = vadd.f32 %v1316_v15, %v1274_v61  ;;  %v1739_v13 = vpop.f32.mrf.mxu3  ;;  %v1277_v51 = vmul.f32 %v4157_v40, %v1245_v41  ;;  %v4158_v61 = vld [vmem:[#allocation28_spill] sm:$0xff]  ;;  %v1892_v41 = vld [vmem:[#allocation3 + $0xf0] sm:$0xff] }
 0x2d4   : > { %v1787_v1 = vadd.f32 %v1739_v13, %v1642_v4  ;;  %v1320_v30 = vpop.xlane.xlu1 %1319  ;;  %1990 = vperm.xlu2 %2466, %v2628_v26   ;;  %v1883_v38 = vld [vmem:[#allocation3 + $0xa8] sm:$0xff]  ;;  %v1632_v45 = vmul.f32 %v4158_v61, %v1440_v63  ;;  %v1260_v13 = vld [vmem:[#allocation3 + $0xd8] sm:$0xff] }
 0x2d5   : > { %v2630_v33 = vpop.eup %2629  ;;  %1403 = vst.msk [vmem:[#allocation3 + $0x48] sm:$0xff] %vm293_vm2, %v1370_v19  ;;  %v1372_v8 = vadd.f32 %v1320_v30, %v1276_v62  ;;  %v1703_v34 = vpop.f32.mrf.mxu1  ;;  %2633 = vrcp.f32 %v1883_v38  ;;  %v4159_v30 = vld [vmem:[#allocation35_spill] sm:$0xff] }
 0x2d6   : > { %1819 = vst.msk [vmem:[#allocation4 + $0xc0] sm:$0xff] %vm358_vm0, %v1787_v1  ;;  %v1775_v16 = vadd.f32 %v1703_v34, %v1630_v7  ;;  %2000 = vperm.xlu0 %2468, %v2630_v33   ;;  %v1885_v5 = vld [vmem:[#allocation3 + $0xb8] sm:$0xff]  ;;  %v1292_v38 = vmul.f32 %v4159_v30, %v1260_v13  ;;  %v1456_v13 = vld [vmem:[#allocation4 + $0xf0] sm:$0xff] }
 0x2d7   : > { %1405 = vst.msk [vmem:[#allocation3 + $0x58] sm:$0xff] %vm293_vm2, %v1372_v8  ;;  %v1318_v32 = vpop.xlane.xlu0 %1317  ;;  %2635 = vrcp.f32 %v1885_v5  ;;  %v1441_v1 = vld [vmem:[#allocation4 + $0x78] sm:$0xff]  ;;  %v1644_v8 = vmul.f32 %v3863_v14, %v1452_v29  ;;  %v4160_v5 = vld [vmem:[#allocation34_spill] sm:$0xff] }
 0x2d8   : > { %v2632_v25 = vpop.eup %2631  ;;  %1807 = vst.msk [vmem:[#allocation4 + $0x60] sm:$0xff] %vm358_vm0, %v1775_v16  ;;  %v1371_v54 = vadd.f32 %v1318_v32, %v1275_v52  ;;  %v1633_v32 = vmul.f32 %v4160_v5, %v1441_v1  ;;  %v1453_v14 = vld [vmem:[#allocation4 + $0xd8] sm:$0xff] }
 0x2d9   : > { %1995 = vperm.xlu1 %2467, %v2632_v25   ;;  %v1884_v11 = vld [vmem:[#allocation3 + $0xb0] sm:$0xff]  ;;  %v1645_v56 = vmul.f32 %v3857_v49, %v1453_v14  ;;  %v1443_v49 = vld [vmem:[#allocation4 + $0x88] sm:$0xff]  ;;  %v4165_v29 = vld [vmem:[#allocation36_spill] sm:$0xff] }
 0x2da   : > { %1404 = vst.msk [vmem:[#allocation3 + $0x50] sm:$0xff] %vm293_vm2, %v1371_v54  ;;  %v1346_v24 = vpop.xlane.xlu2 %1345  ;;  %2637 = vrcp.f32 %v1884_v11  ;;  %v4166_v5 = vld [vmem:[#allocation40_spill] sm:$0xff] }
 0x2db   : > { %v2634_v18 = vpop.eup %2633  ;;  %v1385_v55 = vadd.f32 %v1346_v24, %v1289_v58  ;;  %v1893_v24 = vld [vmem:[#allocation3 + $0xf8] sm:$0xff] }
 0x2dc   : > { %v1350_v9 = vpop.xlane.xlu1 %1349  ;;  %2065 = vperm.xlu2 %2466, %v2634_v18   ;;  %v1871_v37 = vld [vmem:[#allocation3 + $0x48] sm:$0xff] }
 0x2dd   : > { %v2636_v12 = vpop.eup %2635  ;;  %1418 = vst.msk [vmem:[#allocation3 + $0xc0] sm:$0xff] %vm293_vm2, %v1385_v55  ;;  %v1387_v47 = vadd.f32 %v1350_v9, %v1291_v43  ;;  %v1706_v31 = vpop.f32.mrf.mxu1  ;;  %2639 = vrcp.f32 %v1871_v37  ;;  %v1442_v55 = vld [vmem:[#allocation4 + $0x80] sm:$0xff] }
 0x2de   : > { %v1776_v28 = vadd.f32 %v1706_v31, %v1631_v10  ;;  %2075 = vperm.xlu0 %2468, %v2636_v12   ;;  %v1873_v17 = vld [vmem:[#allocation3 + $0x58] sm:$0xff]  ;;  %v1634_v10 = vmul.f32 %v4161_v0, %v1442_v55  ;;  %v1454_v31 = vld [vmem:[#allocation4 + $0xe0] sm:$0xff] }
 0x2df   : > { %1420 = vst.msk [vmem:[#allocation3 + $0xd0] sm:$0xff] %vm293_vm2, %v1387_v47  ;;  %v1348_v60 = vpop.xlane.xlu0 %1347  ;;  %2641 = vrcp.f32 %v1873_v17 }
 0x2e0   : > { %v2638_v23 = vpop.eup %2637  ;;  %1808 = vst.msk [vmem:[#allocation4 + $0x68] sm:$0xff] %vm358_vm0, %v1776_v28  ;;  %v1386_v50 = vadd.f32 %v1348_v60, %v1290_v22  ;;  %v1742_v46 = vpop.f32.mrf.mxu3  ;;  %v1646_v22 = vmul.f32 %v4162_v2, %v1454_v31  ;;  %v1926_v60 = vld [vmem:[#allocation4] sm:$0xff] }
 0x2e1   : > { %v1788_v21 = vadd.f32 %v1742_v46, %v1643_v6  ;;  %2070 = vperm.xlu1 %2467, %v2638_v23   ;;  %v1872_v48 = vld [vmem:[#allocation3 + $0x50] sm:$0xff] }
 0x2e2   : > { %1419 = vst.msk [vmem:[#allocation3 + $0xc8] sm:$0xff] %vm293_vm2, %v1386_v50  ;;  %v1322_v42 = vpop.xlane.xlu2 %1321  ;;  %2643 = vrcp.f32 %v1872_v48  ;;  %v4163_v50 = vld [vmem:[#allocation39_spill] sm:$0xff]  ;;  %v1455_v48 = vld [vmem:[#allocation4 + $0xe8] sm:$0xff] }
 0x2e3   : > { %v2640_v53 = vpop.eup %2639  ;;  %1820 = vst.msk [vmem:[#allocation4 + $0xc8] sm:$0xff] %vm358_vm0, %v1788_v21  ;;  %v1373_v57 = vadd.f32 %v1322_v42, %v1277_v51  ;;  %v1635_v46 = vmul.f32 %v4163_v50, %v1443_v49  ;;  %v1444_v42 = vld [vmem:[#allocation4 + $0x90] sm:$0xff] }
 0x2e4   : > { %2005 = vperm.xlu2 %2466, %v2640_v53   ;;  %v1886_v4 = vld [vmem:[#allocation3 + $0xc0] sm:$0xff]  ;;  %v4164_v53 = vld [vmem:[#allocation30_spill] sm:$0xff] }
 0x2e5   : > { %v2642_v15 = vpop.eup %2641  ;;  %1406 = vst.msk [vmem:[#allocation3 + $0x60] sm:$0xff] %vm293_vm2, %v1373_v57  ;;  %v1709_v26 = vpop.f32.mrf.mxu1  ;;  %2645 = vrcp.f32 %v1886_v4  ;;  %v1647_v57 = vmul.f32 %v4164_v53, %v1455_v48  ;;  %v1636_v4 = vmul.f32 %v3719_v39, %v1444_v42  ;;  %v1931_v48 = vld [vmem:[#allocation4 + $0x28] sm:$0xff] }
 0x2e6   : > { %v1777_v19 = vadd.f32 %v1709_v26, %v1632_v45  ;;  %2015 = vperm.xlu0 %2468, %v2642_v15   ;;  %v1888_v62 = vld [vmem:[#allocation3 + $0xd0] sm:$0xff] }
 0x2e7   : > { %2647 = vrcp.f32 %v1888_v62  ;;  %v1445_v62 = vld [vmem:[#allocation4 + $0x98] sm:$0xff] }
 0x2e8   : > { %v2644_v7 = vpop.eup %2643  ;;  %1809 = vst.msk [vmem:[#allocation4 + $0x70] sm:$0xff] %vm358_vm0, %v1777_v19  ;;  %v1637_v30 = vmul.f32 %v3750_v59, %v1445_v62 }
 0x2e9   : > { %2010 = vperm.xlu1 %2467, %v2644_v7   ;;  %v1887_v33 = vld [vmem:[#allocation3 + $0xc8] sm:$0xff]  ;;  %v1648_v7 = vmul.f32 %v4165_v29, %v1456_v13 }
 0x2ea   : > { %v1352_v34 = vpop.xlane.xlu2 %1351  ;;  %2649 = vrcp.f32 %v1887_v33 }
 0x2eb   : > { %v2646_v16 = vpop.eup %2645  ;;  %v1388_v52 = vadd.f32 %v1352_v34, %v1292_v38  ;;  %v1745_v3 = vpop.f32.mrf.mxu3 }
 0x2ec   : > { %v1789_v25 = vadd.f32 %v1745_v3, %v1644_v8  ;;  %2080 = vperm.xlu2 %2466, %v2646_v16   ;;  %v1874_v54 = vld [vmem:[#allocation3 + $0x60] sm:$0xff]  ;;  %v1457_v8 = vld [vmem:[#allocation4 + $0xf8] sm:$0xff] }
 0x2ed   : > { %v2648_v44 = vpop.eup %2647  ;;  %1421 = vst.msk [vmem:[#allocation3 + $0xd8] sm:$0xff] %vm293_vm2, %v1388_v52  ;;  %v1712_v58 = vpop.f32.mrf.mxu1  ;;  %2651 = vrcp.f32 %v1874_v54  ;;  %v1446_v3 = vld [vmem:[#allocation4 + $0xa0] sm:$0xff] }
 0x2ee   : > { %1821 = vst.msk [vmem:[#allocation4 + $0xd0] sm:$0xff] %vm358_vm0, %v1789_v25  ;;  %v1778_v11 = vadd.f32 %v1712_v58, %v1633_v32  ;;  %2090 = vperm.xlu0 %2468, %v2648_v44   ;;  %2653 = vrcp.f32 %v1891_v35  ;;  %v1649_v32 = vmul.f32 %v4166_v5, %v1457_v8  ;;  %v1638_v59 = vmul.f32 %v3742_v27, %v1446_v3  ;;  %v1929_v27 = vld [vmem:[#allocation4 + $0x18] sm:$0xff]  ;;  %v1938_v5 = vld [vmem:[#allocation4 + $0x60] sm:$0xff] }
 0x2ef   : > { %2655 = vrcp.f32 %v1893_v24  ;;  %v1940_v58 = vld [vmem:[#allocation4 + $0x70] sm:$0xff]  ;;  %v1939_v24 = vld [vmem:[#allocation4 + $0x68] sm:$0xff] }
 0x2f0   : > { %v2650_v18 = vpop.eup %2649  ;;  %1810 = vst.msk [vmem:[#allocation4 + $0x78] sm:$0xff] %vm358_vm0, %v1778_v11 }
 0x2f1   : > { %2085 = vperm.xlu1 %2467, %v2650_v18  }
 0x2f3   : > { %v2652_v43 = vpop.eup %2651  ;;  %v1748_v20 = vpop.f32.mrf.mxu3 }
 0x2f4   : > { %v1790_v36 = vadd.f32 %v1748_v20, %v1645_v56  ;;  %2020 = vperm.xlu2 %2466, %v2652_v43   ;;  %v1889_v9 = vld [vmem:[#allocation3 + $0xd8] sm:$0xff]  ;;  %v2654_v37 = vpop.eup %2653 }
 0x2f5   : > { %v1715_v12 = vpop.f32.mrf.mxu1  ;;  %2657 = vrcp.f32 %v1889_v9  ;;  %v2656_v28 = vpop.eup %2655 }
 0x2f6   : > { %1822 = vst.msk [vmem:[#allocation4 + $0xd8] sm:$0xff] %vm358_vm0, %v1790_v36  ;;  %v1779_v47 = vadd.f32 %v1715_v12, %v1634_v10  ;;  %2105 = vperm.xlu0 %2468, %v2654_v37   ;;  %2659 = vrcp.f32 %v1892_v41  ;;  %v1928_v12 = vld [vmem:[#allocation4 + $0x10] sm:$0xff] }
 0x2f7   : > { %v1941_v34 = vld [vmem:[#allocation4 + $0x78] sm:$0xff] }
 0x2f8   : > { %1811 = vst.msk [vmem:[#allocation4 + $0x80] sm:$0xff] %vm358_vm0, %v1779_v47 }
 0x2f9   : > { %2115 = vperm.xlu1 %2467, %v2656_v28   ;;  %v1927_v28 = vld [vmem:[#allocation4 + $0x8] sm:$0xff] }
 0x2fb   : > { %v2658_v17 = vpop.eup %2657  ;;  %v1751_v6 = vpop.f32.mrf.mxu3 }
 0x2fc   : > { %v1961_v23 = vpop.permute.xlu2 %1960  ;;  %v1791_v63 = vadd.f32 %v1751_v6, %v1646_v22  ;;  %2095 = vperm.xlu2 %2466, %v2658_v17   ;;  %v2660_v61 = vpop.eup %2659  ;;  %v1932_v22 = vld [vmem:[#allocation4 + $0x30] sm:$0xff] }
 0x2fd   : > { %v2118_v21 = vmul.f32 %v1961_v23, %v1926_v60  ;;  %v1718_v40 = vpop.f32.mrf.mxu1 }
 0x2fe   : > { %1823 = vst.msk [vmem:[#allocation4 + $0xe0] sm:$0xff] %vm358_vm0, %v1791_v63  ;;  %v1780_v51 = vadd.f32 %v1718_v40, %v1635_v46 }
 0x2ff   : > { %2150 = vst.msk [vmem:[%s3972_s29] sm:$0xff] %vm358_vm0, %v2118_v21  ;;  %v1942_v50 = vld [vmem:[#allocation4 + $0x80] sm:$0xff]  ;;  %v1947_v21 = vld [vmem:[#allocation4 + $0xa8] sm:$0xff] }
 0x300   : > { %1812 = vst.msk [vmem:[#allocation4 + $0x88] sm:$0xff] %vm358_vm0, %v1780_v51 }
 0x303   : > { %v1754_v45 = vpop.f32.mrf.mxu3 }
 0x304   : > { %v1792_v15 = vadd.f32 %v1754_v45, %v1647_v57  ;;  %2110 = vperm.xlu2 %2466, %v2660_v61   ;;  %v1930_v57 = vld [vmem:[#allocation4 + $0x20] sm:$0xff] }
 0x305   : > { %v1721_v26 = vpop.f32.mrf.mxu1  ;;  %v1954_v20 = vld [vmem:[#allocation4 + $0xe0] sm:$0xff] }
 0x306   : > { %1824 = vst.msk [vmem:[#allocation4 + $0xe8] sm:$0xff] %vm358_vm0, %v1792_v15  ;;  %v1781_v19 = vadd.f32 %v1721_v26, %v1636_v4  ;;  %v1935_v4 = vld [vmem:[#allocation4 + $0x48] sm:$0xff] }
 0x307   : > { %v1943_v6 = vld [vmem:[#allocation4 + $0x88] sm:$0xff] }
 0x308   : > { %1813 = vst.msk [vmem:[#allocation4 + $0x90] sm:$0xff] %vm358_vm0, %v1781_v19 }
 0x30b   : > { %v1757_v1 = vpop.f32.mrf.mxu3 }
 0x30c   : > { %v1793_v38 = vadd.f32 %v1757_v1, %v1648_v7 }
 0x30d   : > { %v1724_v33 = vpop.f32.mrf.mxu1 }
 0x30e   : > { %1825 = vst.msk [vmem:[#allocation4 + $0xf0] sm:$0xff] %vm358_vm0, %v1793_v38  ;;  %v1782_v39 = vadd.f32 %v1724_v33, %v1637_v30  ;;  %v1950_v30 = vld [vmem:[#allocation4 + $0xc0] sm:$0xff] }
 0x30f   : > { %v2036_v16 = vpop.permute.xlu2 %2035  ;;  %v1944_v36 = vld [vmem:[#allocation4 + $0x90] sm:$0xff] }
 0x310   : > { %1814 = vst.msk [vmem:[#allocation4 + $0x98] sm:$0xff] %vm358_vm0, %v1782_v39  ;;  %v2133_v52 = vmul.f32 %v2036_v16, %v1941_v34  ;;  %v1934_v39 = vld [vmem:[#allocation4 + $0x40] sm:$0xff]  ;;  %v1933_v16 = vld [vmem:[#allocation4 + $0x38] sm:$0xff] }
 0x312   : > { %2165 = vst.msk [vmem:[%s3972_s29 + $0x78] sm:$0xff] %vm358_vm0, %v2133_v52 }
 0x313   : > { %v1760_v25 = vpop.f32.mrf.mxu3 }
 0x314   : > { %v1794_v54 = vadd.f32 %v1760_v25, %v1649_v32 }
 0x315   : > { %v1727_v35 = vpop.f32.mrf.mxu1 }
 0x316   : > { %1826 = vst.msk [vmem:[#allocation4 + $0xf8] sm:$0xff] %vm358_vm0, %v1794_v54  ;;  %v1783_v44 = vadd.f32 %v1727_v35, %v1638_v59  ;;  %v1949_v59 = vld [vmem:[#allocation4 + $0xb8] sm:$0xff] }
 0x317   : > { %v1945_v29 = vld [vmem:[#allocation4 + $0x98] sm:$0xff] }
 0x318   : > { %1815 = vst.msk [vmem:[#allocation4 + $0xa0] sm:$0xff] %vm358_vm0, %v1783_v44  ;;  %v2031_v11 = vpop.permute.xlu0 %2030  ;;  %v1948_v44 = vld [vmem:[#allocation4 + $0xb0] sm:$0xff] }
 0x319   : > { %v2132_v14 = vmul.f32 %v2031_v11, %v1940_v58 }
 0x31b   : > { %2164 = vst.msk [vmem:[%s3972_s29 + $0x70] sm:$0xff] %vm358_vm0, %v2132_v14  ;;  %v2026_v18 = vpop.permute.xlu1 %2025  ;;  %v1953_v14 = vld [vmem:[#allocation4 + $0xd8] sm:$0xff] }
 0x31c   : > { %v2131_v55 = vmul.f32 %v2026_v18, %v1939_v24 }
 0x31e   : > { %2163 = vst.msk [vmem:[%s3972_s29 + $0x68] sm:$0xff] %vm358_vm0, %v2131_v55  ;;  %v1976_v56 = vpop.permute.xlu2 %1975  ;;  %v1937_v55 = vld [vmem:[#allocation4 + $0x58] sm:$0xff] }
 0x31f   : > { %v2121_v43 = vmul.f32 %v1976_v56, %v1929_v27  ;;  %v1946_v19 = vld [vmem:[#allocation4 + $0xa0] sm:$0xff] }
 0x321   : > { %2153 = vst.msk [vmem:[%s3972_s29 + $0x18] sm:$0xff] %vm358_vm0, %v2121_v43  ;;  %v1936_v43 = vld [vmem:[#allocation4 + $0x50] sm:$0xff] }
 0x323   : > { %v2101_v0 = vpop.permute.xlu1 %2100 }
 0x324   : > { %v2146_v10 = vmul.f32 %v2101_v0, %v1954_v20 }
 0x326   : > { %2178 = vst.msk [vmem:[%s3972_s29 + $0xe0] sm:$0xff] %vm358_vm0, %v2146_v10  ;;  %v2051_v9 = vpop.permute.xlu2 %2050  ;;  %v1956_v10 = vld [vmem:[#allocation4 + $0xf0] sm:$0xff] }
 0x327   : > { %v2136_v37 = vmul.f32 %v2051_v9, %v1944_v36 }
 0x328   : > { %v1971_v47 = vpop.permute.xlu0 %1970 }
 0x329   : > { %2168 = vst.msk [vmem:[%s3972_s29 + $0x90] sm:$0xff] %vm358_vm0, %v2136_v37  ;;  %v2120_v31 = vmul.f32 %v1971_v47, %v1928_v12  ;;  %v1952_v37 = vld [vmem:[#allocation4 + $0xd0] sm:$0xff] }
 0x32b   : > { %2152 = vst.msk [vmem:[%s3972_s29 + $0x10] sm:$0xff] %vm358_vm0, %v2120_v31  ;;  %v1966_v49 = vpop.permute.xlu1 %1965  ;;  %v1951_v31 = vld [vmem:[#allocation4 + $0xc8] sm:$0xff] }
 0x32c   : > { %v2119_v2 = vmul.f32 %v1966_v49, %v1927_v28 }
 0x32e   : > { %2151 = vst.msk [vmem:[%s3972_s29 + $0x8] sm:$0xff] %vm358_vm0, %v2119_v2  ;;  %v1991_v41 = vpop.permute.xlu2 %1990  ;;  %v1955_v2 = vld [vmem:[#allocation4 + $0xe8] sm:$0xff] }
 0x32f   : > { %v2124_v17 = vmul.f32 %v1991_v41, %v1932_v22 }
 0x330   : > { %v2046_v60 = vpop.permute.xlu0 %2045 }
 0x331   : > { %2156 = vst.msk [vmem:[%s3972_s29 + $0x30] sm:$0xff] %vm358_vm0, %v2124_v17  ;;  %v2135_v23 = vmul.f32 %v2046_v60, %v1943_v6  ;;  %v1957_v17 = vld [vmem:[#allocation4 + $0xf8] sm:$0xff] }
 0x333   : > { %2167 = vst.msk [vmem:[%s3972_s29 + $0x88] sm:$0xff] %vm358_vm0, %v2135_v23  ;;  %v2041_v46 = vpop.permute.xlu1 %2040 }
 0x334   : > { %v2134_v63 = vmul.f32 %v2041_v46, %v1942_v50 }
 0x336   : > { %2166 = vst.msk [vmem:[%s3972_s29 + $0x80] sm:$0xff] %vm358_vm0, %v2134_v63  ;;  %v2066_v40 = vpop.permute.xlu2 %2065 }
 0x337   : > { %v2139_v51 = vmul.f32 %v2066_v40, %v1947_v21 }
 0x338   : > { %v1986_v42 = vpop.permute.xlu0 %1985 }
 0x339   : > { %2171 = vst.msk [vmem:[%s3972_s29 + $0xa8] sm:$0xff] %vm358_vm0, %v2139_v51  ;;  %v2123_v53 = vmul.f32 %v1986_v42, %v1931_v48 }
 0x33b   : > { %2155 = vst.msk [vmem:[%s3972_s29 + $0x28] sm:$0xff] %vm358_vm0, %v2123_v53  ;;  %v1981_v61 = vpop.permute.xlu1 %1980 }
 0x33c   : > { %v2122_v45 = vmul.f32 %v1981_v61, %v1930_v57 }
 0x33e   : > { %2154 = vst.msk [vmem:[%s3972_s29 + $0x20] sm:$0xff] %vm358_vm0, %v2122_v45  ;;  %v2006_v15 = vpop.permute.xlu2 %2005 }
 0x33f   : > { %v2127_v26 = vmul.f32 %v2006_v15, %v1935_v4 }
 0x340   : > { %v2061_v13 = vpop.permute.xlu0 %2060 }
 0x341   : > { %2159 = vst.msk [vmem:[%s3972_s29 + $0x48] sm:$0xff] %vm358_vm0, %v2127_v26  ;;  %v2138_v62 = vmul.f32 %v2061_v13, %v1946_v19 }
 0x343   : > { %2170 = vst.msk [vmem:[%s3972_s29 + $0xa0] sm:$0xff] %vm358_vm0, %v2138_v62  ;;  %v2056_v7 = vpop.permute.xlu1 %2055 }
 0x344   : > { %v2137_v1 = vmul.f32 %v2056_v7, %v1945_v29 }
 0x346   : > { %2169 = vst.msk [vmem:[%s3972_s29 + $0x98] sm:$0xff] %vm358_vm0, %v2137_v1  ;;  %v2081_v38 = vpop.permute.xlu2 %2080 }
 0x347   : > { %v2142_v33 = vmul.f32 %v2081_v38, %v1950_v30 }
 0x348   : > { %v2001_v8 = vpop.permute.xlu0 %2000 }
 0x349   : > { %2174 = vst.msk [vmem:[%s3972_s29 + $0xc0] sm:$0xff] %vm358_vm0, %v2142_v33  ;;  %v2126_v34 = vmul.f32 %v2001_v8, %v1934_v39 }
 0x34b   : > { %2158 = vst.msk [vmem:[%s3972_s29 + $0x40] sm:$0xff] %vm358_vm0, %v2126_v34  ;;  %v1996_v52 = vpop.permute.xlu1 %1995 }
 0x34c   : > { %v2125_v3 = vmul.f32 %v1996_v52, %v1933_v16 }
 0x34e   : > { %2157 = vst.msk [vmem:[%s3972_s29 + $0x38] sm:$0xff] %vm358_vm0, %v2125_v3  ;;  %v2021_v32 = vpop.permute.xlu2 %2020 }
 0x34f   : > { %v2130_v25 = vmul.f32 %v2021_v32, %v1938_v5 }
 0x350   : > { %v2076_v54 = vpop.permute.xlu0 %2075 }
 0x351   : > { %2162 = vst.msk [vmem:[%s3972_s29 + $0x60] sm:$0xff] %vm358_vm0, %v2130_v25  ;;  %v2141_v35 = vmul.f32 %v2076_v54, %v1949_v59 }
 0x353   : > { %2173 = vst.msk [vmem:[%s3972_s29 + $0xb8] sm:$0xff] %vm358_vm0, %v2141_v35  ;;  %v2071_v58 = vpop.permute.xlu1 %2070 }
 0x354   : > { %v2140_v11 = vmul.f32 %v2071_v58, %v1948_v44 }
 0x356   : > { %2172 = vst.msk [vmem:[%s3972_s29 + $0xb0] sm:$0xff] %vm358_vm0, %v2140_v11  ;;  %v2096_v24 = vpop.permute.xlu2 %2095 }
 0x357   : > { %v2145_v18 = vmul.f32 %v2096_v24, %v1953_v14 }
 0x358   : > { %v2016_v27 = vpop.permute.xlu0 %2015 }
 0x359   : > { %2177 = vst.msk [vmem:[%s3972_s29 + $0xd8] sm:$0xff] %vm358_vm0, %v2145_v18  ;;  %v2129_v56 = vmul.f32 %v2016_v27, %v1937_v55 }
 0x35b   : > { %2161 = vst.msk [vmem:[%s3972_s29 + $0x58] sm:$0xff] %vm358_vm0, %v2129_v56  ;;  %v2011_v20 = vpop.permute.xlu1 %2010 }
 0x35c   : > { %v2128_v0 = vmul.f32 %v2011_v20, %v1936_v43 }
 0x35e   : > { %2160 = vst.msk [vmem:[%s3972_s29 + $0x50] sm:$0xff] %vm358_vm0, %v2128_v0  ;;  %v2111_v36 = vpop.permute.xlu2 %2110 }
 0x35f   : > { %v2148_v9 = vmul.f32 %v2111_v36, %v1956_v10 }
 0x360   : > { %v2091_v12 = vpop.permute.xlu0 %2090 }
 0x361   : > { %2180 = vst.msk [vmem:[%s3972_s29 + $0xf0] sm:$0xff] %vm358_vm0, %v2148_v9  ;;  %v2144_v47 = vmul.f32 %v2091_v12, %v1952_v37 }
 0x363   : > { %2176 = vst.msk [vmem:[%s3972_s29 + $0xd0] sm:$0xff] %vm358_vm0, %v2144_v47  ;;  %v2086_v28 = vpop.permute.xlu1 %2085 }
 0x364   : > { %v2143_v49 = vmul.f32 %v2086_v28, %v1951_v31 }
 0x366   : > { %2175 = vst.msk [vmem:[%s3972_s29 + $0xc8] sm:$0xff] %vm358_vm0, %v2143_v49 }
 0x368   : > { %v2106_v22 = vpop.permute.xlu0 %2105 }
 0x369   : > { %v2147_v41 = vmul.f32 %v2106_v22, %v1955_v2 }
 0x36b   : > { %2179 = vst.msk [vmem:[%s3972_s29 + $0xe8] sm:$0xff] %vm358_vm0, %v2147_v41  ;;  %v2116_v6 = vpop.permute.xlu1 %2115 }
 0x36c   : > { %v2149_v60 = vmul.f32 %v2116_v6, %v1957_v17 }
 0x36e   : > { %2181 = vst.msk [vmem:[%s3972_s29 + $0xf8] sm:$0xff] %vm358_vm0, %v2149_v60 }
 0x36f PF: > { %s13_s14 = sadd.s32 1, %s2683_s14   ;;  %s4167_s12 = smov %s2679_s13 }
 0x370   : > { %p10_p5 = scmp.ge.s32.totalorder %s13_s14, 6   ;;  %s4168_s13 = smov %s4170_s15 }
 0x372   :  { %12 = sbr.rel (!%p10_p5) target bundleno = 2 (0x2), region = 76 }

</bundles_post_ra>
